<compile_context>
chip_gen: v6e
topology: v6e:2x2x1
jax: 0.10.0
libtpu: 0.0.40
codegen_flags: <defaults>
</compile_context>

<pallas_src>
import functools

import numpy as np

import jax
import jax.numpy as jnp
from jax.experimental import pallas as pl
from jax.experimental.pallas import tpu as pltpu


# -----------------------------------------------------------------------------
# Packed-parameter slab layout.  Every sub-block starts at a multiple of 8
# sublanes so static ref slices stay cheap aligned views.
# -----------------------------------------------------------------------------
# Row indices inside the small-vector bank at the bottom of the slab.
_R_CW0, _R_CW1, _R_CW2 = 0, 1, 2   # conv taps for x[t-1], x[t], x[t+1]   (C lanes)
_R_CB = 3                          # conv bias                            (C lanes)
_R_BL = 4                          # fused LSTM bias b_ih + b_hh          (4H lanes)
_R_WA = 5                          # attn_fc weight                       (H lanes)
_R_BT1, _R_BT2 = 6, 7              # topic MLP biases                     (H2 lanes)
_R_BF1 = 8                         # fc_out[0] bias                       (F2 lanes)
_R_WF2 = 9                         # fc_out[3] weight                     (F2 lanes)
_R_SC = 10                         # lane 0: attn_fc bias, lane 1: fc_out[3] bias
_N_VEC_ROWS = 11


def _rup8(x):
    return ((x + 7) // 8) * 8


def _slab_layout(C, H, T, H2, F2):
    """Row offsets of every sub-block inside the packed parameter slab."""
    off = {}
    off["wih"] = 0                            # (C, 4H)   fused LSTM W_ih (i|f|g|o)
    off["whh"] = off["wih"] + _rup8(C)        # (H, 4H)   fused LSTM W_hh (i|f|g|o)
    off["wt1"] = off["whh"] + _rup8(H)        # (T, H2)   topic MLP layer 1 weight^T
    off["wt2"] = off["wt1"] + _rup8(T)        # (H2, H2)  topic MLP layer 2 weight^T
    off["wf1"] = off["wt2"] + _rup8(H2)       # (H+H2,F2) fc_out[0] weight^T (seq|topic)
    off["vec"] = off["wf1"] + _rup8(H + H2)   # small-vector bank
    n_rows = off["vec"] + _rup8(_N_VEC_ROWS)
    lanes = max(128, 4 * H)
    return off, n_rows, lanes


# -----------------------------------------------------------------------------
# Kernel
# -----------------------------------------------------------------------------
def smp_kernel(xs_ref, topic_ref, p_ref, out_ref, *, B, S, C, H, H2, T, F2):
    SB = S * B
    H4 = 4 * H
    f32 = jnp.float32
    off, _, _ = _slab_layout(C, H, T, H2, F2)
    VO = off["vec"]

    # ---- Conv1d(1 -> C, k=3, pad=1) + ReLU  (dropout == identity) -----------
    # xs is the time-major flattened sequence, row r = t*B + b.
    xs = xs_ref[...]                                              # (SB, 1)
    zero_b = jnp.zeros((B, 1), f32)
    x_prev = jnp.concatenate([zero_b, xs[: SB - B, :]], axis=0)   # x[t-1], t=0 row -> 0
    x_next = jnp.concatenate([xs[B:, :], zero_b], axis=0)         # x[t+1], t=S-1 row -> 0
    xsh = jnp.concatenate([x_prev, xs, x_next], axis=1)           # (SB, 3)
    cw3 = p_ref[VO + _R_CW0: VO + _R_CW0 + 3, :C]                 # (3, C) taps, contiguous
    conv = jnp.maximum(
        jnp.dot(xsh, cw3, preferred_element_type=f32)
        + p_ref[VO + _R_CB: VO + _R_CB + 1, :C], 0.0)             # (SB, C)

    # ---- LSTM input projection, hoisted out of the recurrence ----------------
    wih = p_ref[off["wih"]: off["wih"] + C, :H4]                  # (C, 4H)
    gates_x = (jnp.dot(conv, wih, preferred_element_type=f32)
               + p_ref[VO + _R_BL: VO + _R_BL + 1, :H4])          # (SB, 4H)

    # ---- LSTM recurrence (fully unrolled), gate order (i, f, g, o) -----------
    whh = p_ref[off["whh"]: off["whh"] + H, :H4]                  # (H, 4H)
    h = jnp.zeros((B, H), f32)
    c = jnp.zeros((B, H), f32)
    hs = []
    for t in range(S):
        g_all = gates_x[t * B:(t + 1) * B, :] + jnp.dot(
            h, whh, preferred_element_type=f32)                   # (B, 4H)
        sig = jax.nn.sigmoid(g_all)        # one EUP pass over the full gate vreg
        g_g = jnp.tanh(g_all[:, 2 * H:3 * H])
        c = sig[:, H:2 * H] * c + sig[:, 0:H] * g_g
        h = sig[:, 3 * H:4 * H] * jnp.tanh(c)
        hs.append(h)
    # TODO(synk): latch whh in the MXU across steps (pltpu.matmul_push_rhs /
    # matmul_acc_lhs / matmul_pop, folding gates_x into the MRB accumulator on
    # v7x) once the explicit-MXU f32 path is validated; jnp.dot kept for
    # portability/correctness here.

    # ---- attention pooling: per-batch softmax over the S steps ---------------
    wa = p_ref[VO + _R_WA: VO + _R_WA + 1, :H]                    # (1, H)
    ba = p_ref[VO + _R_SC: VO + _R_SC + 1, 0:1]                   # (1, 1)
    scores = jnp.concatenate(
        [jnp.sum(ht * wa, axis=-1, keepdims=True) for ht in hs], axis=1) + ba  # (B, S)
    m_b = jnp.max(scores, axis=1, keepdims=True)                  # per-batch max
    e = jnp.exp(scores - m_b)                                     # (B, S)
    inv_denom = pl.reciprocal(jnp.sum(e, axis=1, keepdims=True), approx=True)
    numer = e[:, 0:1] * hs[0]
    for t in range(1, S):
        numer = numer + e[:, t:t + 1] * hs[t]
    seq_repr = numer * inv_denom                                  # (B, H)

    # ---- topic MLP (dropout == identity) --------------------------------------
    topic = topic_ref[...]                                        # (B, T)
    wt1 = p_ref[off["wt1"]: off["wt1"] + T, :H2]
    t1 = jnp.maximum(jnp.dot(topic, wt1, preferred_element_type=f32)
                     + p_ref[VO + _R_BT1: VO + _R_BT1 + 1, :H2], 0.0)       # (B, H2)
    wt2 = p_ref[off["wt2"]: off["wt2"] + H2, :H2]
    topic_repr = jnp.maximum(jnp.dot(t1, wt2, preferred_element_type=f32)
                             + p_ref[VO + _R_BT2: VO + _R_BT2 + 1, :H2], 0.0)

    # ---- fusion + fc_out (single matmul on the concatenated representation) ---
    fused = jnp.concatenate([seq_repr, topic_repr], axis=1)       # (B, H+H2)
    wf1 = p_ref[off["wf1"]: off["wf1"] + H + H2, :F2]
    f1 = jnp.maximum(jnp.dot(fused, wf1, preferred_element_type=f32)
                     + p_ref[VO + _R_BF1: VO + _R_BF1 + 1, :F2], 0.0)       # (B, F2)
    out_ref[...] = (jnp.sum(f1 * p_ref[VO + _R_WF2: VO + _R_WF2 + 1, :F2],
                            axis=-1, keepdims=True)
                    + p_ref[VO + _R_SC: VO + _R_SC + 1, 1:2])     # (B, 1)


# -----------------------------------------------------------------------------
# One-time parameter packing (host side).  Call once per parameter pytree and
# reuse the slab; none of this work runs inside the per-call jitted forward.
# -----------------------------------------------------------------------------
def pack_params(params):
    def f32(x):
        return np.asarray(jax.device_get(x), dtype=np.float32)

    C = params["wih"].shape[1]
    H = params["whh"].shape[1]
    T = params["wt1"].shape[0]
    H2 = params["wt1"].shape[1]
    F2 = params["wf1a"].shape[1]
    H4 = 4 * H
    off, n_rows, lanes = _slab_layout(C, H, T, H2, F2)

    wih_f = np.concatenate([f32(params["wih"][g]) for g in range(4)], axis=1)  # (C, 4H)
    whh_f = np.concatenate([f32(params["whh"][g]) for g in range(4)], axis=1)  # (H, 4H)
    bl_f = np.concatenate([f32(params["bl"][g])[0] for g in range(4)], axis=0)  # (4H,)
    wf1 = np.concatenate([f32(params["wf1a"]), f32(params["wf1b"])], axis=0)   # (H+H2, F2)

    slab = np.zeros((n_rows, lanes), np.float32)
    slab[off["wih"]:off["wih"] + C, :H4] = wih_f
    slab[off["whh"]:off["whh"] + H, :H4] = whh_f
    slab[off["wt1"]:off["wt1"] + T, :H2] = f32(params["wt1"])
    slab[off["wt2"]:off["wt2"] + H2, :H2] = f32(params["wt2"])
    slab[off["wf1"]:off["wf1"] + H + H2, :F2] = wf1
    v = off["vec"]
    slab[v + _R_CW0:v + _R_CW0 + 3, :C] = f32(params["cw"])       # 3 conv taps
    slab[v + _R_CB, :C] = f32(params["cb"])[0]
    slab[v + _R_BL, :H4] = bl_f
    slab[v + _R_WA, :H] = f32(params["wa"])[0]
    slab[v + _R_BT1, :H2] = f32(params["bt1"])[0]
    slab[v + _R_BT2, :H2] = f32(params["bt2"])[0]
    slab[v + _R_BF1, :F2] = f32(params["bf1"])[0]
    slab[v + _R_WF2, :F2] = f32(params["wf2"])[:, 0]
    slab[v + _R_SC, 0] = f32(params["ba"])[0, 0]
    slab[v + _R_SC, 1] = f32(params["bf2"])[0, 0]

    return jnp.asarray(slab), (C, H, H2, F2)


# -----------------------------------------------------------------------------
# Per-call forward.  The only per-call prep is the time-major relayout of the
# (B, S) sequence into an (S*B, 1) column; the kernel gets 3 operands total.
# -----------------------------------------------------------------------------
@functools.partial(jax.jit, static_argnames=("dims",))
def stock_movement_predictor(stock_seq, topic_vec, param_slab, *, dims):
    B, S = stock_seq.shape
    T = topic_vec.shape[1]
    C, H, H2, F2 = dims
    SB = S * B

    xs = stock_seq.astype(jnp.float32).T.reshape(SB, 1)   # row r = t*B + b

    kernel = functools.partial(smp_kernel, B=B, S=S, C=C, H=H, H2=H2, T=T, F2=F2)
    vmem = pl.BlockSpec(memory_space=pltpu.MemorySpace.VMEM)
    return pl.pallas_call(
        kernel,
        out_shape=jax.ShapeDtypeStruct((B, 1), jnp.float32),
        in_specs=[vmem, vmem, vmem],
        out_specs=vmem,
    )(xs, topic_vec.astype(jnp.float32), param_slab)
    # TODO(synk): once each core would get >= ~8 batch rows (B >= 16), add a
    # batch grid with dimension_semantics=("parallel",) to use both v7x
    # TensorCores; at B=2 it would be a regression.


# -----------------------------------------------------------------------------
# Pure-JAX reference (same math, same synthetic weights)
# -----------------------------------------------------------------------------
def reference(stock_seq, topic_vec, params):
    B, S = stock_seq.shape
    H = params["whh"].shape[1]
    xp = jnp.pad(stock_seq, ((0, 0), (1, 1)))
    conv = (xp[:, 0:S, None] * params["cw"][0]
            + xp[:, 1:S + 1, None] * params["cw"][1]
            + xp[:, 2:S + 2, None] * params["cw"][2]
            + params["cb"][0])
    conv = jnp.maximum(conv, 0.0)                                     # (B, S, C)

    h = jnp.zeros((B, H), jnp.float32)
    c = jnp.zeros((B, H), jnp.float32)
    outs = []
    for t in range(S):
        x_t = conv[:, t, :]
        i_g = jax.nn.sigmoid(x_t @ params["wih"][0] + h @ params["whh"][0] + params["bl"][0])
        f_g = jax.nn.sigmoid(x_t @ params["wih"][1] + h @ params["whh"][1] + params["bl"][1])
        g_g = jnp.tanh(x_t @ params["wih"][2] + h @ params["whh"][2] + params["bl"][2])
        o_g = jax.nn.sigmoid(x_t @ params["wih"][3] + h @ params["whh"][3] + params["bl"][3])
        c = f_g * c + i_g * g_g
        h = o_g * jnp.tanh(c)
        outs.append(h)
    lstm_out = jnp.stack(outs, axis=1)                                # (B, S, H)

    scores = jnp.sum(lstm_out * params["wa"][0][None, None, :], axis=-1) + params["ba"][0, 0]
    attn = jax.nn.softmax(scores, axis=1)[:, :, None]
    seq_repr = jnp.sum(lstm_out * attn, axis=1)                       # (B, H)

    t1 = jnp.maximum(topic_vec @ params["wt1"] + params["bt1"], 0.0)
    topic_repr = jnp.maximum(t1 @ params["wt2"] + params["bt2"], 0.0)

    f1 = jnp.maximum(seq_repr @ params["wf1a"] + topic_repr @ params["wf1b"] + params["bf1"], 0.0)
    return f1 @ params["wf2"] + params["bf2"]


# -----------------------------------------------------------------------------
# Deterministic synthetic parameters
# -----------------------------------------------------------------------------
def make_params(key, topic_dim, hidden_dim):
    C = 32                       # conv output channels (fixed in the module)
    H = hidden_dim
    H2 = hidden_dim // 2
    F = H + H2
    F2 = F // 2
    keys = jax.random.split(key, 20)

    def w(k, shape, scale=0.1):
        return (scale * jax.random.normal(k, shape)).astype(jnp.float32)

    return {
        "cw": w(keys[0], (3, C)),            # conv weight (k, c)
        "cb": w(keys[1], (1, C)),
        "wih": w(keys[2], (4, C, H)),        # LSTM W_ih^T per gate (i, f, g, o)
        "whh": w(keys[3], (4, H, H)),        # LSTM W_hh^T per gate
        "bl": w(keys[4], (4, 1, H)),         # b_ih + b_hh per gate
        "wa": w(keys[5], (1, H)),            # attn_fc
        "ba": w(keys[6], (1, 1)),
        "wt1": w(keys[7], (topic_dim, H2)),
        "bt1": w(keys[8], (1, H2)),
        "wt2": w(keys[9], (H2, H2)),
        "bt2": w(keys[10], (1, H2)),
        "wf1a": w(keys[11], (H, F2)),        # fc_out[0] weight^T, seq part
        "wf1b": w(keys[12], (H2, F2)),       # fc_out[0] weight^T, topic part
        "bf1": w(keys[13], (1, F2)),
        "wf2": w(keys[14], (F2, 1)),
        "bf2": w(keys[15], (1, 1)),
    }


if __name__ == "__main__":
    B, S, T, H = 2, 8, 32, 32    # small shapes consistent with the module

    key = jax.random.PRNGKey(0)
    k_params, k_stock, k_topic = jax.random.split(key, 3)
    params = make_params(k_params, topic_dim=T, hidden_dim=H)
    stock_seq = jax.random.normal(k_stock, (B, S), dtype=jnp.float32)
    topic_vec = jax.random.normal(k_topic, (B, T), dtype=jnp.float32)

    param_slab, dims = pack_params(params)     # one-time, host-side packing

    out = stock_movement_predictor(stock_seq, topic_vec, param_slab, dims=dims)
    out = jax.block_until_ready(out)

    ref = jax.block_until_ready(reference(stock_seq, topic_vec, params))
    max_err = float(jnp.max(jnp.abs(out - ref)))
    assert out.shape == (B, 1), out.shape
    assert max_err < 2e-2, f"mismatch vs reference: {max_err}"

    print("KERNEL_OK")
</pallas_src>

<mosaic_0001>
module attributes {stable_mosaic.version = 11 : i64} {
  func.func @smp_kernel(%arg0: memref<16x1xf32, #tpu.memory_space<vmem>>, %arg1: memref<2x32xf32, #tpu.memory_space<vmem>>, %arg2: memref<176x128xf32, #tpu.memory_space<vmem>>, %arg3: memref<2x1xf32, #tpu.memory_space<vmem>>) attributes {dimension_semantics = [], scalar_prefetch = 0 : i64, scratch_operands = 0 : i64, tpu.core_type = #tpu.core_type<tc>} {
    %c0 = arith.constant 0 : index
    %c0_0 = arith.constant 0 : index
    %0 = vector.load %arg0[%c0, %c0_0] : memref<16x1xf32, #tpu.memory_space<vmem>>, vector<16x1xf32>
    %cst = arith.constant 0.000000e+00 : f32
    %1 = vector.broadcast %cst : f32 to vector<2x1xf32>
    %2 = vector.extract_strided_slice %0 {offsets = [0, 0], sizes = [14, 1], strides = [1, 1]} : vector<16x1xf32> to vector<14x1xf32>
    %3 = tpu.concatenate %1, %2 in 0 : vector<2x1xf32>, vector<14x1xf32> -> vector<16x1xf32>
    %4 = vector.extract_strided_slice %0 {offsets = [2, 0], sizes = [14, 1], strides = [1, 1]} : vector<16x1xf32> to vector<14x1xf32>
    %5 = tpu.concatenate %4, %1 in 0 : vector<14x1xf32>, vector<2x1xf32> -> vector<16x1xf32>
    %6 = tpu.concatenate %3, %0, %5 in 1 : vector<16x1xf32>, vector<16x1xf32>, vector<16x1xf32> -> vector<16x3xf32>
    %c160 = arith.constant 160 : index
    %c0_1 = arith.constant 0 : index
    %7 = vector.load %arg2[%c160, %c0_1] : memref<176x128xf32, #tpu.memory_space<vmem>>, vector<3x32xf32>
    %cst_2 = arith.constant dense<0.000000e+00> : vector<16x32xf32>
    %8 = tpu.matmul %6, %7, %cst_2 {dimension_numbers = #tpu.dot_dimension_numbers<[1], [0], [0], [1], [0, 0, 1, 1], [], []>} : vector<16x3xf32>, vector<3x32xf32>, vector<16x32xf32> -> vector<16x32xf32>
    %c163 = arith.constant 163 : index
    %c0_3 = arith.constant 0 : index
    %9 = vector.load %arg2[%c163, %c0_3] : memref<176x128xf32, #tpu.memory_space<vmem>>, vector<1x32xf32>
    %10 = vector.broadcast %9 : vector<1x32xf32> to vector<16x32xf32>
    %11 = arith.addf %8, %10 : vector<16x32xf32>
    %cst_4 = arith.constant 0.000000e+00 : f32
    %12 = vector.broadcast %cst_4 : f32 to vector<16x32xf32>
    %13 = arith.maximumf %11, %12 : vector<16x32xf32>
    %c0_5 = arith.constant 0 : index
    %c0_6 = arith.constant 0 : index
    %14 = vector.load %arg2[%c0_5, %c0_6] : memref<176x128xf32, #tpu.memory_space<vmem>>, vector<32x128xf32>
    %cst_7 = arith.constant dense<0.000000e+00> : vector<16x128xf32>
    %15 = tpu.matmul %13, %14, %cst_7 {dimension_numbers = #tpu.dot_dimension_numbers<[1], [0], [0], [1], [0, 0, 1, 1], [], []>} : vector<16x32xf32>, vector<32x128xf32>, vector<16x128xf32> -> vector<16x128xf32>
    %c164 = arith.constant 164 : index
    %c0_8 = arith.constant 0 : index
    %16 = vector.load %arg2[%c164, %c0_8] : memref<176x128xf32, #tpu.memory_space<vmem>>, vector<1x128xf32>
    %17 = vector.broadcast %16 : vector<1x128xf32> to vector<16x128xf32>
    %18 = arith.addf %15, %17 : vector<16x128xf32>
    %c32 = arith.constant 32 : index
    %c0_9 = arith.constant 0 : index
    %19 = vector.load %arg2[%c32, %c0_9] : memref<176x128xf32, #tpu.memory_space<vmem>>, vector<32x128xf32>
    %cst_10 = arith.constant 0.000000e+00 : f32
    %20 = vector.broadcast %cst_10 : f32 to vector<2x32xf32>
    %cst_11 = arith.constant 0.000000e+00 : f32
    %21 = vector.broadcast %cst_11 : f32 to vector<2x32xf32>
    %22 = vector.extract_strided_slice %18 {offsets = [0, 0], sizes = [2, 128], strides = [1, 1]} : vector<16x128xf32> to vector<2x128xf32>
    %cst_12 = arith.constant dense<0.000000e+00> : vector<2x128xf32>
    %23 = tpu.matmul %20, %19, %cst_12 {dimension_numbers = #tpu.dot_dimension_numbers<[1], [0], [0], [1], [0, 0, 1, 1], [], []>} : vector<2x32xf32>, vector<32x128xf32>, vector<2x128xf32> -> vector<2x128xf32>
    %24 = arith.addf %22, %23 : vector<2x128xf32>
    %25 = arith.negf %24 : vector<2x128xf32>
    %26 = math.exp %25 : vector<2x128xf32>
    %cst_13 = arith.constant 1.000000e+00 : f32
    %27 = vector.broadcast %cst_13 : f32 to vector<2x128xf32>
    %28 = arith.addf %27, %26 : vector<2x128xf32>
    %29 = arith.divf %27, %28 : vector<2x128xf32>
    %30 = vector.extract_strided_slice %24 {offsets = [0, 64], sizes = [2, 32], strides = [1, 1]} : vector<2x128xf32> to vector<2x32xf32>
    %31 = math.tanh %30 : vector<2x32xf32>
    %32 = vector.extract_strided_slice %29 {offsets = [0, 32], sizes = [2, 32], strides = [1, 1]} : vector<2x128xf32> to vector<2x32xf32>
    %33 = arith.mulf %32, %21 : vector<2x32xf32>
    %34 = vector.extract_strided_slice %29 {offsets = [0, 0], sizes = [2, 32], strides = [1, 1]} : vector<2x128xf32> to vector<2x32xf32>
    %35 = arith.mulf %34, %31 : vector<2x32xf32>
    %36 = arith.addf %33, %35 : vector<2x32xf32>
    %37 = vector.extract_strided_slice %29 {offsets = [0, 96], sizes = [2, 32], strides = [1, 1]} : vector<2x128xf32> to vector<2x32xf32>
    %38 = math.tanh %36 : vector<2x32xf32>
    %39 = arith.mulf %37, %38 : vector<2x32xf32>
    %40 = vector.extract_strided_slice %18 {offsets = [2, 0], sizes = [2, 128], strides = [1, 1]} : vector<16x128xf32> to vector<2x128xf32>
    %cst_14 = arith.constant dense<0.000000e+00> : vector<2x128xf32>
    %41 = tpu.matmul %39, %19, %cst_14 {dimension_numbers = #tpu.dot_dimension_numbers<[1], [0], [0], [1], [0, 0, 1, 1], [], []>} : vector<2x32xf32>, vector<32x128xf32>, vector<2x128xf32> -> vector<2x128xf32>
    %42 = arith.addf %40, %41 : vector<2x128xf32>
    %43 = arith.negf %42 : vector<2x128xf32>
    %44 = math.exp %43 : vector<2x128xf32>
    %cst_15 = arith.constant 1.000000e+00 : f32
    %45 = vector.broadcast %cst_15 : f32 to vector<2x128xf32>
    %46 = arith.addf %45, %44 : vector<2x128xf32>
    %47 = arith.divf %45, %46 : vector<2x128xf32>
    %48 = vector.extract_strided_slice %42 {offsets = [0, 64], sizes = [2, 32], strides = [1, 1]} : vector<2x128xf32> to vector<2x32xf32>
    %49 = math.tanh %48 : vector<2x32xf32>
    %50 = vector.extract_strided_slice %47 {offsets = [0, 32], sizes = [2, 32], strides = [1, 1]} : vector<2x128xf32> to vector<2x32xf32>
    %51 = arith.mulf %50, %36 : vector<2x32xf32>
    %52 = vector.extract_strided_slice %47 {offsets = [0, 0], sizes = [2, 32], strides = [1, 1]} : vector<2x128xf32> to vector<2x32xf32>
    %53 = arith.mulf %52, %49 : vector<2x32xf32>
    %54 = arith.addf %51, %53 : vector<2x32xf32>
    %55 = vector.extract_strided_slice %47 {offsets = [0, 96], sizes = [2, 32], strides = [1, 1]} : vector<2x128xf32> to vector<2x32xf32>
    %56 = math.tanh %54 : vector<2x32xf32>
    %57 = arith.mulf %55, %56 : vector<2x32xf32>
    %58 = vector.extract_strided_slice %18 {offsets = [4, 0], sizes = [2, 128], strides = [1, 1]} : vector<16x128xf32> to vector<2x128xf32>
    %cst_16 = arith.constant dense<0.000000e+00> : vector<2x128xf32>
    %59 = tpu.matmul %57, %19, %cst_16 {dimension_numbers = #tpu.dot_dimension_numbers<[1], [0], [0], [1], [0, 0, 1, 1], [], []>} : vector<2x32xf32>, vector<32x128xf32>, vector<2x128xf32> -> vector<2x128xf32>
    %60 = arith.addf %58, %59 : vector<2x128xf32>
    %61 = arith.negf %60 : vector<2x128xf32>
    %62 = math.exp %61 : vector<2x128xf32>
    %cst_17 = arith.constant 1.000000e+00 : f32
    %63 = vector.broadcast %cst_17 : f32 to vector<2x128xf32>
    %64 = arith.addf %63, %62 : vector<2x128xf32>
    %65 = arith.divf %63, %64 : vector<2x128xf32>
    %66 = vector.extract_strided_slice %60 {offsets = [0, 64], sizes = [2, 32], strides = [1, 1]} : vector<2x128xf32> to vector<2x32xf32>
    %67 = math.tanh %66 : vector<2x32xf32>
    %68 = vector.extract_strided_slice %65 {offsets = [0, 32], sizes = [2, 32], strides = [1, 1]} : vector<2x128xf32> to vector<2x32xf32>
    %69 = arith.mulf %68, %54 : vector<2x32xf32>
    %70 = vector.extract_strided_slice %65 {offsets = [0, 0], sizes = [2, 32], strides = [1, 1]} : vector<2x128xf32> to vector<2x32xf32>
    %71 = arith.mulf %70, %67 : vector<2x32xf32>
    %72 = arith.addf %69, %71 : vector<2x32xf32>
    %73 = vector.extract_strided_slice %65 {offsets = [0, 96], sizes = [2, 32], strides = [1, 1]} : vector<2x128xf32> to vector<2x32xf32>
    %74 = math.tanh %72 : vector<2x32xf32>
    %75 = arith.mulf %73, %74 : vector<2x32xf32>
    %76 = vector.extract_strided_slice %18 {offsets = [6, 0], sizes = [2, 128], strides = [1, 1]} : vector<16x128xf32> to vector<2x128xf32>
    %cst_18 = arith.constant dense<0.000000e+00> : vector<2x128xf32>
    %77 = tpu.matmul %75, %19, %cst_18 {dimension_numbers = #tpu.dot_dimension_numbers<[1], [0], [0], [1], [0, 0, 1, 1], [], []>} : vector<2x32xf32>, vector<32x128xf32>, vector<2x128xf32> -> vector<2x128xf32>
    %78 = arith.addf %76, %77 : vector<2x128xf32>
    %79 = arith.negf %78 : vector<2x128xf32>
    %80 = math.exp %79 : vector<2x128xf32>
    %cst_19 = arith.constant 1.000000e+00 : f32
    %81 = vector.broadcast %cst_19 : f32 to vector<2x128xf32>
    %82 = arith.addf %81, %80 : vector<2x128xf32>
    %83 = arith.divf %81, %82 : vector<2x128xf32>
    %84 = vector.extract_strided_slice %78 {offsets = [0, 64], sizes = [2, 32], strides = [1, 1]} : vector<2x128xf32> to vector<2x32xf32>
    %85 = math.tanh %84 : vector<2x32xf32>
    %86 = vector.extract_strided_slice %83 {offsets = [0, 32], sizes = [2, 32], strides = [1, 1]} : vector<2x128xf32> to vector<2x32xf32>
    %87 = arith.mulf %86, %72 : vector<2x32xf32>
    %88 = vector.extract_strided_slice %83 {offsets = [0, 0], sizes = [2, 32], strides = [1, 1]} : vector<2x128xf32> to vector<2x32xf32>
    %89 = arith.mulf %88, %85 : vector<2x32xf32>
    %90 = arith.addf %87, %89 : vector<2x32xf32>
    %91 = vector.extract_strided_slice %83 {offsets = [0, 96], sizes = [2, 32], strides = [1, 1]} : vector<2x128xf32> to vector<2x32xf32>
    %92 = math.tanh %90 : vector<2x32xf32>
    %93 = arith.mulf %91, %92 : vector<2x32xf32>
    %94 = vector.extract_strided_slice %18 {offsets = [8, 0], sizes = [2, 128], strides = [1, 1]} : vector<16x128xf32> to vector<2x128xf32>
    %cst_20 = arith.constant dense<0.000000e+00> : vector<2x128xf32>
    %95 = tpu.matmul %93, %19, %cst_20 {dimension_numbers = #tpu.dot_dimension_numbers<[1], [0], [0], [1], [0, 0, 1, 1], [], []>} : vector<2x32xf32>, vector<32x128xf32>, vector<2x128xf32> -> vector<2x128xf32>
    %96 = arith.addf %94, %95 : vector<2x128xf32>
    %97 = arith.negf %96 : vector<2x128xf32>
    %98 = math.exp %97 : vector<2x128xf32>
    %cst_21 = arith.constant 1.000000e+00 : f32
    %99 = vector.broadcast %cst_21 : f32 to vector<2x128xf32>
    %100 = arith.addf %99, %98 : vector<2x128xf32>
    %101 = arith.divf %99, %100 : vector<2x128xf32>
    %102 = vector.extract_strided_slice %96 {offsets = [0, 64], sizes = [2, 32], strides = [1, 1]} : vector<2x128xf32> to vector<2x32xf32>
    %103 = math.tanh %102 : vector<2x32xf32>
    %104 = vector.extract_strided_slice %101 {offsets = [0, 32], sizes = [2, 32], strides = [1, 1]} : vector<2x128xf32> to vector<2x32xf32>
    %105 = arith.mulf %104, %90 : vector<2x32xf32>
    %106 = vector.extract_strided_slice %101 {offsets = [0, 0], sizes = [2, 32], strides = [1, 1]} : vector<2x128xf32> to vector<2x32xf32>
    %107 = arith.mulf %106, %103 : vector<2x32xf32>
    %108 = arith.addf %105, %107 : vector<2x32xf32>
    %109 = vector.extract_strided_slice %101 {offsets = [0, 96], sizes = [2, 32], strides = [1, 1]} : vector<2x128xf32> to vector<2x32xf32>
    %110 = math.tanh %108 : vector<2x32xf32>
    %111 = arith.mulf %109, %110 : vector<2x32xf32>
    %112 = vector.extract_strided_slice %18 {offsets = [10, 0], sizes = [2, 128], strides = [1, 1]} : vector<16x128xf32> to vector<2x128xf32>
    %cst_22 = arith.constant dense<0.000000e+00> : vector<2x128xf32>
    %113 = tpu.matmul %111, %19, %cst_22 {dimension_numbers = #tpu.dot_dimension_numbers<[1], [0], [0], [1], [0, 0, 1, 1], [], []>} : vector<2x32xf32>, vector<32x128xf32>, vector<2x128xf32> -> vector<2x128xf32>
    %114 = arith.addf %112, %113 : vector<2x128xf32>
    %115 = arith.negf %114 : vector<2x128xf32>
    %116 = math.exp %115 : vector<2x128xf32>
    %cst_23 = arith.constant 1.000000e+00 : f32
    %117 = vector.broadcast %cst_23 : f32 to vector<2x128xf32>
    %118 = arith.addf %117, %116 : vector<2x128xf32>
    %119 = arith.divf %117, %118 : vector<2x128xf32>
    %120 = vector.extract_strided_slice %114 {offsets = [0, 64], sizes = [2, 32], strides = [1, 1]} : vector<2x128xf32> to vector<2x32xf32>
    %121 = math.tanh %120 : vector<2x32xf32>
    %122 = vector.extract_strided_slice %119 {offsets = [0, 32], sizes = [2, 32], strides = [1, 1]} : vector<2x128xf32> to vector<2x32xf32>
    %123 = arith.mulf %122, %108 : vector<2x32xf32>
    %124 = vector.extract_strided_slice %119 {offsets = [0, 0], sizes = [2, 32], strides = [1, 1]} : vector<2x128xf32> to vector<2x32xf32>
    %125 = arith.mulf %124, %121 : vector<2x32xf32>
    %126 = arith.addf %123, %125 : vector<2x32xf32>
    %127 = vector.extract_strided_slice %119 {offsets = [0, 96], sizes = [2, 32], strides = [1, 1]} : vector<2x128xf32> to vector<2x32xf32>
    %128 = math.tanh %126 : vector<2x32xf32>
    %129 = arith.mulf %127, %128 : vector<2x32xf32>
    %130 = vector.extract_strided_slice %18 {offsets = [12, 0], sizes = [2, 128], strides = [1, 1]} : vector<16x128xf32> to vector<2x128xf32>
    %cst_24 = arith.constant dense<0.000000e+00> : vector<2x128xf32>
    %131 = tpu.matmul %129, %19, %cst_24 {dimension_numbers = #tpu.dot_dimension_numbers<[1], [0], [0], [1], [0, 0, 1, 1], [], []>} : vector<2x32xf32>, vector<32x128xf32>, vector<2x128xf32> -> vector<2x128xf32>
    %132 = arith.addf %130, %131 : vector<2x128xf32>
    %133 = arith.negf %132 : vector<2x128xf32>
    %134 = math.exp %133 : vector<2x128xf32>
    %cst_25 = arith.constant 1.000000e+00 : f32
    %135 = vector.broadcast %cst_25 : f32 to vector<2x128xf32>
    %136 = arith.addf %135, %134 : vector<2x128xf32>
    %137 = arith.divf %135, %136 : vector<2x128xf32>
    %138 = vector.extract_strided_slice %132 {offsets = [0, 64], sizes = [2, 32], strides = [1, 1]} : vector<2x128xf32> to vector<2x32xf32>
    %139 = math.tanh %138 : vector<2x32xf32>
    %140 = vector.extract_strided_slice %137 {offsets = [0, 32], sizes = [2, 32], strides = [1, 1]} : vector<2x128xf32> to vector<2x32xf32>
    %141 = arith.mulf %140, %126 : vector<2x32xf32>
    %142 = vector.extract_strided_slice %137 {offsets = [0, 0], sizes = [2, 32], strides = [1, 1]} : vector<2x128xf32> to vector<2x32xf32>
    %143 = arith.mulf %142, %139 : vector<2x32xf32>
    %144 = arith.addf %141, %143 : vector<2x32xf32>
    %145 = vector.extract_strided_slice %137 {offsets = [0, 96], sizes = [2, 32], strides = [1, 1]} : vector<2x128xf32> to vector<2x32xf32>
    %146 = math.tanh %144 : vector<2x32xf32>
    %147 = arith.mulf %145, %146 : vector<2x32xf32>
    %148 = vector.extract_strided_slice %18 {offsets = [14, 0], sizes = [2, 128], strides = [1, 1]} : vector<16x128xf32> to vector<2x128xf32>
    %cst_26 = arith.constant dense<0.000000e+00> : vector<2x128xf32>
    %149 = tpu.matmul %147, %19, %cst_26 {dimension_numbers = #tpu.dot_dimension_numbers<[1], [0], [0], [1], [0, 0, 1, 1], [], []>} : vector<2x32xf32>, vector<32x128xf32>, vector<2x128xf32> -> vector<2x128xf32>
    %150 = arith.addf %148, %149 : vector<2x128xf32>
    %151 = arith.negf %150 : vector<2x128xf32>
    %152 = math.exp %151 : vector<2x128xf32>
    %cst_27 = arith.constant 1.000000e+00 : f32
    %153 = vector.broadcast %cst_27 : f32 to vector<2x128xf32>
    %154 = arith.addf %153, %152 : vector<2x128xf32>
    %155 = arith.divf %153, %154 : vector<2x128xf32>
    %156 = vector.extract_strided_slice %150 {offsets = [0, 64], sizes = [2, 32], strides = [1, 1]} : vector<2x128xf32> to vector<2x32xf32>
    %157 = math.tanh %156 : vector<2x32xf32>
    %158 = vector.extract_strided_slice %155 {offsets = [0, 32], sizes = [2, 32], strides = [1, 1]} : vector<2x128xf32> to vector<2x32xf32>
    %159 = arith.mulf %158, %144 : vector<2x32xf32>
    %160 = vector.extract_strided_slice %155 {offsets = [0, 0], sizes = [2, 32], strides = [1, 1]} : vector<2x128xf32> to vector<2x32xf32>
    %161 = arith.mulf %160, %157 : vector<2x32xf32>
    %162 = arith.addf %159, %161 : vector<2x32xf32>
    %163 = vector.extract_strided_slice %155 {offsets = [0, 96], sizes = [2, 32], strides = [1, 1]} : vector<2x128xf32> to vector<2x32xf32>
    %164 = math.tanh %162 : vector<2x32xf32>
    %165 = arith.mulf %163, %164 : vector<2x32xf32>
    %c165 = arith.constant 165 : index
    %c0_28 = arith.constant 0 : index
    %166 = vector.load %arg2[%c165, %c0_28] : memref<176x128xf32, #tpu.memory_space<vmem>>, vector<1x32xf32>
    %c170 = arith.constant 170 : index
    %c0_29 = arith.constant 0 : index
    %167 = vector.load %arg2[%c170, %c0_29] : memref<176x128xf32, #tpu.memory_space<vmem>>, vector<1x1xf32>
    %168 = vector.broadcast %166 : vector<1x32xf32> to vector<2x32xf32>
    %169 = arith.mulf %39, %168 : vector<2x32xf32>
    %cst_30 = arith.constant dense<0.000000e+00> : vector<2xf32>
    %170 = vector.multi_reduction <add>, %169, %cst_30 [1] : vector<2x32xf32> to vector<2xf32>
    %171 = vector.shape_cast %170 : vector<2xf32> to vector<2x1xf32>
    %172 = vector.broadcast %166 : vector<1x32xf32> to vector<2x32xf32>
    %173 = arith.mulf %57, %172 : vector<2x32xf32>
    %cst_31 = arith.constant dense<0.000000e+00> : vector<2xf32>
    %174 = vector.multi_reduction <add>, %173, %cst_31 [1] : vector<2x32xf32> to vector<2xf32>
    %175 = vector.shape_cast %174 : vector<2xf32> to vector<2x1xf32>
    %176 = vector.broadcast %166 : vector<1x32xf32> to vector<2x32xf32>
    %177 = arith.mulf %75, %176 : vector<2x32xf32>
    %cst_32 = arith.constant dense<0.000000e+00> : vector<2xf32>
    %178 = vector.multi_reduction <add>, %177, %cst_32 [1] : vector<2x32xf32> to vector<2xf32>
    %179 = vector.shape_cast %178 : vector<2xf32> to vector<2x1xf32>
    %180 = vector.broadcast %166 : vector<1x32xf32> to vector<2x32xf32>
    %181 = arith.mulf %93, %180 : vector<2x32xf32>
    %cst_33 = arith.constant dense<0.000000e+00> : vector<2xf32>
    %182 = vector.multi_reduction <add>, %181, %cst_33 [1] : vector<2x32xf32> to vector<2xf32>
    %183 = vector.shape_cast %182 : vector<2xf32> to vector<2x1xf32>
    %184 = vector.broadcast %166 : vector<1x32xf32> to vector<2x32xf32>
    %185 = arith.mulf %111, %184 : vector<2x32xf32>
    %cst_34 = arith.constant dense<0.000000e+00> : vector<2xf32>
    %186 = vector.multi_reduction <add>, %185, %cst_34 [1] : vector<2x32xf32> to vector<2xf32>
    %187 = vector.shape_cast %186 : vector<2xf32> to vector<2x1xf32>
    %188 = vector.broadcast %166 : vector<1x32xf32> to vector<2x32xf32>
    %189 = arith.mulf %129, %188 : vector<2x32xf32>
    %cst_35 = arith.constant dense<0.000000e+00> : vector<2xf32>
    %190 = vector.multi_reduction <add>, %189, %cst_35 [1] : vector<2x32xf32> to vector<2xf32>
    %191 = vector.shape_cast %190 : vector<2xf32> to vector<2x1xf32>
    %192 = vector.broadcast %166 : vector<1x32xf32> to vector<2x32xf32>
    %193 = arith.mulf %147, %192 : vector<2x32xf32>
    %cst_36 = arith.constant dense<0.000000e+00> : vector<2xf32>
    %194 = vector.multi_reduction <add>, %193, %cst_36 [1] : vector<2x32xf32> to vector<2xf32>
    %195 = vector.shape_cast %194 : vector<2xf32> to vector<2x1xf32>
    %196 = vector.broadcast %166 : vector<1x32xf32> to vector<2x32xf32>
    %197 = arith.mulf %165, %196 : vector<2x32xf32>
    %cst_37 = arith.constant dense<0.000000e+00> : vector<2xf32>
    %198 = vector.multi_reduction <add>, %197, %cst_37 [1] : vector<2x32xf32> to vector<2xf32>
    %199 = vector.shape_cast %198 : vector<2xf32> to vector<2x1xf32>
    %200 = tpu.concatenate %171, %175, %179, %183, %187, %191, %195, %199 in 1 : vector<2x1xf32>, vector<2x1xf32>, vector<2x1xf32>, vector<2x1xf32>, vector<2x1xf32>, vector<2x1xf32>, vector<2x1xf32>, vector<2x1xf32> -> vector<2x8xf32>
    %201 = vector.broadcast %167 : vector<1x1xf32> to vector<2x8xf32>
    %202 = arith.addf %200, %201 : vector<2x8xf32>
    %cst_38 = arith.constant dense<0xFF800000> : vector<2xf32>
    %203 = vector.multi_reduction <maximumf>, %202, %cst_38 [1] : vector<2x8xf32> to vector<2xf32>
    %204 = vector.shape_cast %203 : vector<2xf32> to vector<2x1xf32>
    %205 = vector.broadcast %204 : vector<2x1xf32> to vector<2x8xf32>
    %206 = arith.subf %202, %205 : vector<2x8xf32>
    %207 = math.exp %206 : vector<2x8xf32>
    %cst_39 = arith.constant dense<0.000000e+00> : vector<2xf32>
    %208 = vector.multi_reduction <add>, %207, %cst_39 [1] : vector<2x8xf32> to vector<2xf32>
    %209 = vector.shape_cast %208 : vector<2xf32> to vector<2x1xf32>
    %210 = tpu.reciprocal %209 {approx = true} : vector<2x1xf32> -> vector<2x1xf32>
    %211 = vector.extract_strided_slice %207 {offsets = [0, 0], sizes = [2, 1], strides = [1, 1]} : vector<2x8xf32> to vector<2x1xf32>
    %212 = vector.broadcast %211 : vector<2x1xf32> to vector<2x32xf32>
    %213 = arith.mulf %212, %39 : vector<2x32xf32>
    %214 = vector.extract_strided_slice %207 {offsets = [0, 1], sizes = [2, 1], strides = [1, 1]} : vector<2x8xf32> to vector<2x1xf32>
    %215 = vector.broadcast %214 : vector<2x1xf32> to vector<2x32xf32>
    %216 = arith.mulf %215, %57 : vector<2x32xf32>
    %217 = arith.addf %213, %216 : vector<2x32xf32>
    %218 = vector.extract_strided_slice %207 {offsets = [0, 2], sizes = [2, 1], strides = [1, 1]} : vector<2x8xf32> to vector<2x1xf32>
    %219 = vector.broadcast %218 : vector<2x1xf32> to vector<2x32xf32>
    %220 = arith.mulf %219, %75 : vector<2x32xf32>
    %221 = arith.addf %217, %220 : vector<2x32xf32>
    %222 = vector.extract_strided_slice %207 {offsets = [0, 3], sizes = [2, 1], strides = [1, 1]} : vector<2x8xf32> to vector<2x1xf32>
    %223 = vector.broadcast %222 : vector<2x1xf32> to vector<2x32xf32>
    %224 = arith.mulf %223, %93 : vector<2x32xf32>
    %225 = arith.addf %221, %224 : vector<2x32xf32>
    %226 = vector.extract_strided_slice %207 {offsets = [0, 4], sizes = [2, 1], strides = [1, 1]} : vector<2x8xf32> to vector<2x1xf32>
    %227 = vector.broadcast %226 : vector<2x1xf32> to vector<2x32xf32>
    %228 = arith.mulf %227, %111 : vector<2x32xf32>
    %229 = arith.addf %225, %228 : vector<2x32xf32>
    %230 = vector.extract_strided_slice %207 {offsets = [0, 5], sizes = [2, 1], strides = [1, 1]} : vector<2x8xf32> to vector<2x1xf32>
    %231 = vector.broadcast %230 : vector<2x1xf32> to vector<2x32xf32>
    %232 = arith.mulf %231, %129 : vector<2x32xf32>
    %233 = arith.addf %229, %232 : vector<2x32xf32>
    %234 = vector.extract_strided_slice %207 {offsets = [0, 6], sizes = [2, 1], strides = [1, 1]} : vector<2x8xf32> to vector<2x1xf32>
    %235 = vector.broadcast %234 : vector<2x1xf32> to vector<2x32xf32>
    %236 = arith.mulf %235, %147 : vector<2x32xf32>
    %237 = arith.addf %233, %236 : vector<2x32xf32>
    %238 = vector.extract_strided_slice %207 {offsets = [0, 7], sizes = [2, 1], strides = [1, 1]} : vector<2x8xf32> to vector<2x1xf32>
    %239 = vector.broadcast %238 : vector<2x1xf32> to vector<2x32xf32>
    %240 = arith.mulf %239, %165 : vector<2x32xf32>
    %241 = arith.addf %237, %240 : vector<2x32xf32>
    %242 = vector.broadcast %210 : vector<2x1xf32> to vector<2x32xf32>
    %243 = arith.mulf %241, %242 : vector<2x32xf32>
    %c0_40 = arith.constant 0 : index
    %c0_41 = arith.constant 0 : index
    %244 = vector.load %arg1[%c0_40, %c0_41] : memref<2x32xf32, #tpu.memory_space<vmem>>, vector<2x32xf32>
    %c64 = arith.constant 64 : index
    %c0_42 = arith.constant 0 : index
    %245 = vector.load %arg2[%c64, %c0_42] : memref<176x128xf32, #tpu.memory_space<vmem>>, vector<32x16xf32>
    %cst_43 = arith.constant dense<0.000000e+00> : vector<2x16xf32>
    %246 = tpu.matmul %244, %245, %cst_43 {dimension_numbers = #tpu.dot_dimension_numbers<[1], [0], [0], [1], [0, 0, 1, 1], [], []>} : vector<2x32xf32>, vector<32x16xf32>, vector<2x16xf32> -> vector<2x16xf32>
    %c166 = arith.constant 166 : index
    %c0_44 = arith.constant 0 : index
    %247 = vector.load %arg2[%c166, %c0_44] : memref<176x128xf32, #tpu.memory_space<vmem>>, vector<1x16xf32>
    %248 = vector.broadcast %247 : vector<1x16xf32> to vector<2x16xf32>
    %249 = arith.addf %246, %248 : vector<2x16xf32>
    %cst_45 = arith.constant 0.000000e+00 : f32
    %250 = vector.broadcast %cst_45 : f32 to vector<2x16xf32>
    %251 = arith.maximumf %249, %250 : vector<2x16xf32>
    %c96 = arith.constant 96 : index
    %c0_46 = arith.constant 0 : index
    %252 = vector.load %arg2[%c96, %c0_46] : memref<176x128xf32, #tpu.memory_space<vmem>>, vector<16x16xf32>
    %cst_47 = arith.constant dense<0.000000e+00> : vector<2x16xf32>
    %253 = tpu.matmul %251, %252, %cst_47 {dimension_numbers = #tpu.dot_dimension_numbers<[1], [0], [0], [1], [0, 0, 1, 1], [], []>} : vector<2x16xf32>, vector<16x16xf32>, vector<2x16xf32> -> vector<2x16xf32>
    %c167 = arith.constant 167 : index
    %c0_48 = arith.constant 0 : index
    %254 = vector.load %arg2[%c167, %c0_48] : memref<176x128xf32, #tpu.memory_space<vmem>>, vector<1x16xf32>
    %255 = vector.broadcast %254 : vector<1x16xf32> to vector<2x16xf32>
    %256 = arith.addf %253, %255 : vector<2x16xf32>
    %cst_49 = arith.constant 0.000000e+00 : f32
    %257 = vector.broadcast %cst_49 : f32 to vector<2x16xf32>
    %258 = arith.maximumf %256, %257 : vector<2x16xf32>
    %259 = tpu.concatenate %243, %258 in 1 : vector<2x32xf32>, vector<2x16xf32> -> vector<2x48xf32>
    %c112 = arith.constant 112 : index
    %c0_50 = arith.constant 0 : index
    %260 = vector.load %arg2[%c112, %c0_50] : memref<176x128xf32, #tpu.memory_space<vmem>>, vector<48x24xf32>
    %cst_51 = arith.constant dense<0.000000e+00> : vector<2x24xf32>
    %261 = tpu.matmul %259, %260, %cst_51 {dimension_numbers = #tpu.dot_dimension_numbers<[1], [0], [0], [1], [0, 0, 1, 1], [], []>} : vector<2x48xf32>, vector<48x24xf32>, vector<2x24xf32> -> vector<2x24xf32>
    %c168 = arith.constant 168 : index
    %c0_52 = arith.constant 0 : index
    %262 = vector.load %arg2[%c168, %c0_52] : memref<176x128xf32, #tpu.memory_space<vmem>>, vector<1x24xf32>
    %263 = vector.broadcast %262 : vector<1x24xf32> to vector<2x24xf32>
    %264 = arith.addf %261, %263 : vector<2x24xf32>
    %cst_53 = arith.constant 0.000000e+00 : f32
    %265 = vector.broadcast %cst_53 : f32 to vector<2x24xf32>
    %266 = arith.maximumf %264, %265 : vector<2x24xf32>
    %c169 = arith.constant 169 : index
    %c0_54 = arith.constant 0 : index
    %267 = vector.load %arg2[%c169, %c0_54] : memref<176x128xf32, #tpu.memory_space<vmem>>, vector<1x24xf32>
    %268 = vector.broadcast %267 : vector<1x24xf32> to vector<2x24xf32>
    %269 = arith.mulf %266, %268 : vector<2x24xf32>
    %cst_55 = arith.constant dense<0.000000e+00> : vector<2xf32>
    %270 = vector.multi_reduction <add>, %269, %cst_55 [1] : vector<2x24xf32> to vector<2xf32>
    %271 = vector.shape_cast %270 : vector<2xf32> to vector<2x1xf32>
    %c170_56 = arith.constant 170 : index
    %c1 = arith.constant 1 : index
    %272 = vector.load %arg2[%c170_56, %c1] : memref<176x128xf32, #tpu.memory_space<vmem>>, vector<1x1xf32>
    %273 = vector.broadcast %272 : vector<1x1xf32> to vector<2x1xf32>
    %274 = arith.addf %271, %273 : vector<2x1xf32>
    %c0_57 = arith.constant 0 : index
    %c0_58 = arith.constant 0 : index
    %275 = vector.load %arg3[%c0_57, %c0_58] : memref<2x1xf32, #tpu.memory_space<vmem>>, vector<2x1xf32>
    tpu.vector_store %arg3[%c0_57, %c0_58], %274 {strides = array<i32>} : memref<2x1xf32, #tpu.memory_space<vmem>>, vector<2x1xf32>,
    return
  }
}

</mosaic_0001>

<bundles_post_ra>
// kernel: stock_movement_predictor.1
= control target key start
LH: loop header
LB: loop body
LE: loop exit
PB: predicated region body
PF: predicated region fallthrough
CT: control target
= control target key end

     0   :  { %8 = vsyncpa [#allocation3], 0  ;;  %s1939_s12 = smov [#allocation2]   ;;  %s2241_s0 = inlined_call_operand.vmem [shape: f32[16,1], index: 0, kind: input, shape index: {}]   ;;  %s2242_s1 = inlined_call_operand.vmem [shape: f32[2,32], index: 1, kind: input, shape index: {}]   ;;  %s2243_s2 = inlined_call_operand.hbm [shape: f32[176,128], index: 2, kind: input, shape index: {}]   ;;  %s2244_s3 = inlined_call_operand.vmem [shape: f32[2,1], index: 3, kind: output, shape index: {}]  }
   0x1   :  { %s18_s13 = sshll.u32 %s1939_s12, 4  ;;  %s19_s13 = int_to_ptr.vmem [resolvable:$true] %s18_s13 }
   0x2   :  { %s1925_s14 = scalar_lea.vmem %s19_s13, 2816  ;;  %p1930_p1 = scmp.lt.s32.totalorder %s19_s13, %s19_s13 }
   0x3   :  { %p1926_p0 = scmp.ne.s32.totalorder %s19_s13, %s1925_s14  ;;  %p1931_p2 = scmp.lt.s32.totalorder %s1925_s14, %s1925_s14 }
   0x5   :  { %p1932_p3 = por %p1931_p2, %p1930_p1 }
   0x7   :  { %p1933_p4 = pnand %p1932_p3, %p1926_p0 }
   0x9   :  { %1936 = shalt.err (!%p1933_p4)
}
   0xa   :  { %s1940_s15 = smov 128   ;;  %s1941_s16 = smov 8  }
   0xb   :  { %24 = dma.hbm_to_vmem [thread:$0]  %s2243_s2, 2816, %s19_s13, [#allocation3], %s1940_s15, %s1940_s15, %s1941_s16  }
   0xc   :  { %1937 = dma.done.wait [#allocation3], 2816  }
   0xd   :  { %1938 = vsyncadd [#allocation3], 4294964480  ;;  %vm77_vm0 = vcmask 1042432   ;;  %v28_v0 = vld [vmem:[%s2241_s0] sm:$0xff]  ;;  %v29_v1 = vld [vmem:[%s2241_s0 + $0x8] sm:$0xff]  ;;  %vm39_vm1 = vcmask 1045504  }
   0xe   :  { %v64_v2 = vld [vmem:[#allocation2 + $0xa0] sm:$0x7]  ;;  %s1942_s23 = smov 1   ;;  %v33_v3 = vrot.slane %v28_v0, 6  ;;  %v40_v4 = vrot.slane %v28_v0, 2  ;;  %v41_v5 = vrot.slane %v29_v1, 2 }
   0xf   :  { %45 = vrot.lane.b32.xlu0 %v28_v0, %s1942_s23  ;;  %v34_v6 = vrot.slane %v29_v1, 6  ;;  %1682 = vmatprep.subr.msk.mxu1 %vm77_vm0, %v64_v2  ;;  %vm32_vm2 = vcmask 1041408   ;;  %s1943_s2 = smov 2   ;;  %vm58_vm3 = vcmask 7168   ;;  %vm61_vm4 = vcmask 15360   ;;  %v161_v19 = vld [vmem:[#allocation2 + $0x18] sm:$0xff] }
  0x10   :  { %1683 = vmatpush3.msk.msra.mxu1 %vm77_vm0, %v64_v2  ;;  %v42_v7 = vsel %vm39_vm1, %v40_v4, %v41_v5  ;;  %v44_v9 = vsel %vm39_vm1, %v41_v5, 0.0  ;;  %v38_v10 = vsel %vm32_vm2, 0.0, %v33_v3  ;;  %vm70_vm5 = vcmask 23552   ;;  %v160_v20 = vld [vmem:[#allocation2 + $0x10] sm:$0xff]  ;;  %v1996_v22 = vld [vmem:[#allocation2 + $0x38] sm:$0xff]  ;;  %v159_v23 = vld [vmem:[#allocation2 + $0x8] sm:$0xff] }
  0x11   :  { %v35_v8 = vsel %vm32_vm2, %v33_v3, %v34_v6  ;;  %52 = vrot.lane.b32.xlu1 %v42_v7, %s1943_s2  ;;  %1687 = vmatprep.subr.mxu1 %v161_v19  ;;  %v1944_v21 = vmov 0.0   ;;  %v2000_v24 = vld [vmem:[#allocation2 + $0x30] sm:$0xff]  ;;  %v158_v25 = vld [vmem:[#allocation2] sm:$0xff]  ;;  %v2004_v26 = vld [vmem:[#allocation2 + $0x28] sm:$0xff]  ;;  %vm1945_vm6 = vmmov 0   ;;  %vm167_vm7 = vcmask 261120  }
  0x12   :  { %1698 = vmatprep.subr.mxu0 %v1944_v21  ;;  %v2008_v27 = vld [vmem:[#allocation2 + $0x20] sm:$0xff]  ;;  %1706 = vmatprep.mubr.msk.f32.mxu0 %vm1945_vm6, %v1944_v21  ;;  %s1946_s0 = smov 64   ;;  %s1947_s24 = smov 32   ;;  %vm1119_vm8 = vcmask 257026   ;;  %vm1110_vm9 = vcmask 254976   ;;  %vm1137_vm10 = vcmask 261126  }
  0x13   :  { %47 = vrot.lane.b32.xlu0 %v29_v1, %s1942_s23  ;;  %1699 = vmatpush3.msra.mxu0 %v1996_v22  ;;  %v1588_v28 = vld [vmem:[#allocation2 + $0xa3] ss:$0 sm:$0xff]  ;;  %v1592_v37 = vld [vmem:[#allocation2 + $0xa4] ss:$0 sm:$0xff]  ;;  %s1948_s25 = smov 96   ;;  %vm1128_vm11 = vcmask 259076  }
  0x14   :  { %1700 = vmatprep.subr.mxu0 %v1944_v21  ;;  %vm1194_vm12 = vcmask 31744   ;;  %vm1196_vm13 = vcmask 39936   ;;  %vm1198_vm14 = vcmask 48128   ;;  %vm1200_vm15 = vcmask 56320   ;;  %s1957_s28 = smov 127  }
  0x15   :  { %54 = vrot.lane.b32.xlu1 %v44_v9, %s1943_s2  ;;  %1701 = vmatpush3.msra.mxu0 %v2000_v24  ;;  %vm1207_vm0 = vcmask 58368   ;;  %vm1392_vm1 = vcmask 130048   ;;  %vm1487_vm2 = vcmask 392192  }
  0x16   :  { %1702 = vmatprep.subr.mxu0 %v1944_v21 }
  0x17   :  { %1703 = vmatpush3.msra.mxu0 %v2004_v26 }
  0x18   :  { %1704 = vmatprep.subr.mxu0 %v1944_v21 }
  0x19   :  { %1705 = vmatpush3.msra.mxu0 %v2008_v27 }
  0x1a   :  { %1707 = vmatmul.mubr.f32.vlgmr.msra.gmra.mxu0 %v1944_v21  ;;  %1720 = vmatprep.subr.mxu0 %v1944_v21 }
  0x1b   :  { %1721 = vmatpush3.msra.mxu0 %v1996_v22  ;;  %1728 = vmatprep.mubr.msk.f32.mxu0 %vm1945_vm6, %v1944_v21 }
  0x1c   :  { %1722 = vmatprep.subr.mxu0 %v1944_v21 }
  0x1d   :  { %1723 = vmatpush3.msra.mxu0 %v2000_v24 }
  0x1e   :  { %1724 = vmatprep.subr.mxu0 %v1944_v21 }
  0x1f   :  { %1725 = vmatpush3.msra.mxu0 %v2004_v26 }
  0x20   :  { %1726 = vmatprep.subr.mxu0 %v1944_v21 }
  0x21   :  { %1727 = vmatpush3.msra.mxu0 %v2008_v27 }
  0x22   :  { %1742 = vmatprep.subr.mxu0 %v1944_v21 }
  0x81   :  { %v46_v11 = vpop.permute.xlu0 %45 }
  0x82   :  { %v59_v12 = vsel %vm58_vm3, %v38_v10, %v46_v11 }
  0x83   :  { %v53_v13 = vpop.permute.xlu1 %52 }
  0x84   :  { %v62_v14 = vsel %vm61_vm4, %v59_v12, %v53_v13 }
  0x85   :  { %v48_v15 = vpop.permute.xlu0 %47  ;;  %1684 = vmatprep.mubr.msk.f32.mxu1 %vm70_vm5, %v62_v14 }
  0x86   :  { %v60_v16 = vsel %vm58_vm3, %v35_v8, %v48_v15 }
  0x87   :  { %v55_v17 = vpop.permute.xlu1 %54 }
  0x88   :  { %v63_v18 = vsel %vm61_vm4, %v60_v16, %v55_v17 }
  0x89   :  { %1685 = vmatmul.mubr.msk.f32.vlgmr.msra.gmra.mxu1 %vm70_vm5, %v63_v18 }
  0x8a   :  { %1688 = vmatpush3.msra.mxu1 %v161_v19 }
  0x8b   :  { %1689 = vmatprep.subr.mxu1 %v160_v20 }
  0x8c   :  { %1690 = vmatpush3.msra.mxu1 %v160_v20 }
  0x8d   :  { %1691 = vmatprep.subr.mxu1 %v159_v23 }
  0x8e   :  { %1692 = vmatpush3.msra.mxu1 %v159_v23 }
  0x8f   :  { %1693 = vmatprep.subr.mxu1 %v158_v25 }
  0x90   :  { %1694 = vmatpush3.msra.mxu1 %v158_v25 }
  0x91   :  { %1709 = vmatprep.subr.mxu1 %v1944_v21 }
  0xda   :  { %v322_v35 = vpop.f32.mrf.mxu0 }
  0xdc   :  { %v1708_v36 = vpop.f32.mrf.mxu0 }
 0x149   :  { %v1686_v29 = vpop.f32.mrf.mxu1 }
 0x14a   :  { %v153_v30 = vadd.f32 %v1686_v29, %v1588_v28 }
 0x14b   :  { %v147_v31 = vpop.f32.mrf.mxu1 }
 0x14c   :  { %v148_v32 = vadd.f32 %v1588_v28, %v147_v31  ;;  %v157_v34 = vmax.f32 %v153_v30, 0.0 }
 0x14e   :  { %v156_v33 = vmax.f32 %v148_v32, 0.0 }
 0x150   :  { %1695 = vmatprep.mubr.msk.f32.mxu1 %vm167_vm7, %v156_v33 }
 0x151   :  { %1696 = vmatmul.mubr.msk.f32.vlgmr.msra.gmra.mxu1 %vm167_vm7, %v157_v34 }
 0x152   :  { %1710 = vmatpush3.msra.mxu1 %v1996_v22  ;;  %1717 = vmatprep.mubr.msk.f32.mxu1 %vm1945_vm6, %v1944_v21 }
 0x153   :  { %1711 = vmatprep.subr.mxu1 %v1944_v21 }
 0x154   :  { %1712 = vmatpush3.msra.mxu1 %v2000_v24 }
 0x155   :  { %1713 = vmatprep.subr.mxu1 %v1944_v21 }
 0x156   :  { %1714 = vmatpush3.msra.mxu1 %v2004_v26 }
 0x157   :  { %1715 = vmatprep.subr.mxu1 %v1944_v21 }
 0x158   :  { %1716 = vmatpush3.msra.mxu1 %v2008_v27 }
 0x159   :  { %1731 = vmatprep.subr.mxu1 %v1944_v21 }
 0x211   :  { %v1697_v38 = vpop.f32.mrf.mxu1 }
 0x212   :  { %v2038_v39 = vadd.f32 %v1697_v38, %v1592_v37 }
 0x213   :  { %v240_v40 = vpop.f32.mrf.mxu1 }
 0x214   :  { %v2040_v41 = vadd.f32 %v1592_v37, %v240_v40 }
 0x216   :  { %v326_v42 = vadd.f32 %v322_v35, %v2040_v41 }
 0x218   :  { %1849 = vtanh.f32 %v326_v42  ;;  %v1595_v44 = vmul.f32 -1.442695, %v326_v42 }
 0x21a   :  { %1851 = vpow2.f32 %v1595_v44 }
 0x225   :  { %v1850_v43 = vpop.eup %1849 }
 0x226   :  { %336 = vrot.lane.b32.xlu0 %v1850_v43, %s1946_s0 }
 0x227   :  { %v1852_v45 = vpop.eup %1851 }
 0x228   :  { %v330_v46 = vadd.f32 1.0, %v1852_v45 }
 0x22a   :  { %1853 = vrcp.f32 %v330_v46 }
 0x237   :  { %v1854_v47 = vpop.eup %1853 }
 0x238   :  { %v334_v50 = vmul.f32 0.0, %v1854_v47 }
 0x298   :  { %v337_v48 = vpop.permute.xlu0 %336 }
 0x299   :  { %v339_v49 = vmul.f32 %v1854_v47, %v337_v48 }
 0x29b   :  { %341 = vrot.lane.b32.xlu1 %v339_v49, %s1947_s24 }
 0x30d   :  { %v342_v51 = vpop.permute.xlu1 %341 }
 0x30e   :  { %v344_v52 = vadd.f32 %v342_v51, %v334_v50 }
 0x310   :  { %1855 = vtanh.f32 %v344_v52  ;;  %v438_v4 = vrot.slane %v344_v52, 6 }
 0x31d   :  { %v1856_v53 = vpop.eup %1855 }
 0x31e   :  { %347 = vrot.lane.b32.xlu0 %v1856_v53, %s1946_s0 }
 0x390   :  { %v348_v54 = vpop.permute.xlu0 %347 }
 0x391   :  { %v2046_v55 = vmul.f32 %v1854_v47, %v348_v54 }
 0x393   :  { %352 = vrot.lane.b32.xlu1 %v2046_v55, %s1947_s24 }
 0x405   :  { %v353_v56 = vpop.permute.xlu1 %352 }
 0x406   :  { %1718 = vmatmul.mubr.msk.f32.vlgmr.msra.gmra.mxu1 %vm167_vm7, %v353_v56 }
 0x407   :  { %1732 = vmatpush3.msra.mxu1 %v1996_v22  ;;  %1739 = vmatprep.mubr.msk.f32.mxu1 %vm1945_vm6, %v1944_v21 }
 0x408   :  { %1733 = vmatprep.subr.mxu1 %v1944_v21 }
 0x409   :  { %1734 = vmatpush3.msra.mxu1 %v2000_v24 }
 0x40a   :  { %1735 = vmatprep.subr.mxu1 %v1944_v21 }
 0x40b   :  { %1736 = vmatpush3.msra.mxu1 %v2004_v26 }
 0x40c   :  { %1737 = vmatprep.subr.mxu1 %v1944_v21 }
 0x40d   :  { %1738 = vmatpush3.msra.mxu1 %v2008_v27 }
 0x40e   :  { %1753 = vmatprep.subr.mxu1 %v1944_v21 }
 0x4c6   :  { %v422_v57 = vpop.f32.mrf.mxu1 }
 0x4c7   :  { %v427_v58 = vrot.slane %v422_v57, 6 }
 0x4c8   :  { %v1719_v59 = vpop.f32.mrf.mxu1 }
 0x4c9   :  { %v429_v60 = vadd.f32 %v427_v58, %v2040_v41 }
 0x4cb   :  { %1857 = vtanh.f32 %v429_v60  ;;  %v1597_v62 = vmul.f32 -1.442695, %v429_v60 }
 0x4cd   :  { %1859 = vpow2.f32 %v1597_v62 }
 0x4d8   :  { %v1858_v61 = vpop.eup %1857 }
 0x4d9   :  { %442 = vrot.lane.b32.xlu0 %v1858_v61, %s1946_s0 }
 0x4da   :  { %v1860_v63 = vpop.eup %1859 }
 0x4db   :  { %v433_v0 = vadd.f32 1.0, %v1860_v63 }
 0x4dd   :  { %1861 = vrcp.f32 %v433_v0 }
 0x4ea   :  { %v1862_v1 = vpop.eup %1861 }
 0x4eb   :  { %v440_v5 = vmul.f32 %v1862_v1, %v438_v4 }
 0x54b   :  { %v443_v2 = vpop.permute.xlu0 %442 }
 0x54c   :  { %v445_v3 = vmul.f32 %v1862_v1, %v443_v2 }
 0x54e   :  { %447 = vrot.lane.b32.xlu1 %v445_v3, %s1947_s24 }
 0x5c0   :  { %v448_v6 = vpop.permute.xlu1 %447 }
 0x5c1   :  { %v450_v7 = vadd.f32 %v448_v6, %v440_v5 }
 0x5c3   :  { %1863 = vtanh.f32 %v450_v7  ;;  %v545_v29 = vrot.slane %v450_v7, 6 }
 0x5d0   :  { %v1864_v8 = vpop.eup %1863 }
 0x5d1   :  { %453 = vrot.lane.b32.xlu0 %v1864_v8, %s1946_s0 }
 0x643   :  { %v454_v9 = vpop.permute.xlu0 %453 }
 0x644   :  { %v2065_v10 = vmul.f32 %v1862_v1, %v454_v9 }
 0x646   :  { %v458_v11 = vrot.slane %v2065_v10, 2 }
 0x648   :  { %459 = vrot.lane.b32.xlu1 %v458_v11, %s1947_s24 }
 0x6ba   :  { %v2069_v12 = vpop.permute.xlu1 %459 }
 0x6bb   :  { %1729 = vmatmul.mubr.msk.f32.vlgmr.msra.gmra.mxu0 %vm167_vm7, %v2069_v12 }
 0x6bc   :  { %1743 = vmatpush3.msra.mxu0 %v1996_v22  ;;  %1750 = vmatprep.mubr.msk.f32.mxu0 %vm1945_vm6, %v1944_v21 }
 0x6bd   :  { %1744 = vmatprep.subr.mxu0 %v1944_v21 }
 0x6be   :  { %1745 = vmatpush3.msra.mxu0 %v2000_v24 }
 0x6bf   :  { %1746 = vmatprep.subr.mxu0 %v1944_v21 }
 0x6c0   :  { %1747 = vmatpush3.msra.mxu0 %v2004_v26 }
 0x6c1   :  { %1748 = vmatprep.subr.mxu0 %v1944_v21 }
 0x6c2   :  { %1749 = vmatpush3.msra.mxu0 %v2008_v27 }
 0x6c3   :  { %1764 = vmatprep.subr.mxu0 %v1944_v21 }
 0x77b   :  { %v529_v13 = vpop.f32.mrf.mxu0 }
 0x77c   :  { %v534_v14 = vrot.slane %v529_v13, 4 }
 0x77d   :  { %v1730_v15 = vpop.f32.mrf.mxu0 }
 0x77e   :  { %v536_v16 = vadd.f32 %v534_v14, %v2040_v41 }
 0x780   :  { %1865 = vtanh.f32 %v536_v16  ;;  %v1599_v18 = vmul.f32 -1.442695, %v536_v16 }
 0x782   :  { %1867 = vpow2.f32 %v1599_v18 }
 0x78d   :  { %v1866_v17 = vpop.eup %1865 }
 0x78e   :  { %549 = vrot.lane.b32.xlu0 %v1866_v17, %s1946_s0 }
 0x78f   :  { %v1868_v19 = vpop.eup %1867 }
 0x790   :  { %v540_v20 = vadd.f32 1.0, %v1868_v19 }
 0x792   :  { %1869 = vrcp.f32 %v540_v20 }
 0x79f   :  { %v1870_v23 = vpop.eup %1869 }
 0x7a0   :  { %v547_v30 = vmul.f32 %v1870_v23, %v545_v29 }
 0x800   :  { %v550_v25 = vpop.permute.xlu0 %549 }
 0x801   :  { %v552_v28 = vmul.f32 %v1870_v23, %v550_v25 }
 0x803   :  { %554 = vrot.lane.b32.xlu1 %v552_v28, %s1947_s24 }
 0x875   :  { %v555_v31 = vpop.permute.xlu1 %554 }
 0x876   :  { %v557_v32 = vadd.f32 %v555_v31, %v547_v30 }
 0x878   :  { %1871 = vtanh.f32 %v557_v32  ;;  %v652_v51 = vrot.slane %v557_v32, 6 }
 0x885   :  { %v1872_v33 = vpop.eup %1871 }
 0x886   :  { %560 = vrot.lane.b32.xlu0 %v1872_v33, %s1946_s0 }
 0x8f8   :  { %v561_v34 = vpop.permute.xlu0 %560 }
 0x8f9   :  { %v2087_v35 = vmul.f32 %v1870_v23, %v561_v34 }
 0x8fb   :  { %v565_v36 = vrot.slane %v2087_v35, 4 }
 0x8fd   :  { %566 = vrot.lane.b32.xlu1 %v565_v36, %s1947_s24 }
 0x96f   :  { %v2091_v37 = vpop.permute.xlu1 %566 }
 0x970   :  { %1740 = vmatmul.mubr.msk.f32.vlgmr.msra.gmra.mxu1 %vm167_vm7, %v2091_v37 }
 0x971   :  { %1754 = vmatpush3.msra.mxu1 %v1996_v22  ;;  %1761 = vmatprep.mubr.msk.f32.mxu1 %vm1945_vm6, %v1944_v21 }
 0x972   :  { %1755 = vmatprep.subr.mxu1 %v1944_v21 }
 0x973   :  { %1756 = vmatpush3.msra.mxu1 %v2000_v24 }
 0x974   :  { %1757 = vmatprep.subr.mxu1 %v1944_v21 }
 0x975   :  { %1758 = vmatpush3.msra.mxu1 %v2004_v26 }
 0x976   :  { %1759 = vmatprep.subr.mxu1 %v1944_v21 }
 0x977   :  { %1760 = vmatpush3.msra.mxu1 %v2008_v27 }
 0x978   :  { %1775 = vmatprep.subr.mxu1 %v1944_v21 }
 0xa30   :  { %v636_v38 = vpop.f32.mrf.mxu1 }
 0xa31   :  { %v641_v40 = vrot.slane %v636_v38, 2 }
 0xa32   :  { %v1741_v42 = vpop.f32.mrf.mxu1 }
 0xa33   :  { %v643_v43 = vadd.f32 %v641_v40, %v2040_v41 }
 0xa35   :  { %1873 = vtanh.f32 %v643_v43  ;;  %v1601_v45 = vmul.f32 -1.442695, %v643_v43 }
 0xa37   :  { %1875 = vpow2.f32 %v1601_v45 }
 0xa42   :  { %v1874_v44 = vpop.eup %1873 }
 0xa43   :  { %656 = vrot.lane.b32.xlu0 %v1874_v44, %s1946_s0 }
 0xa44   :  { %v1876_v46 = vpop.eup %1875 }
 0xa45   :  { %v647_v47 = vadd.f32 1.0, %v1876_v46 }
 0xa47   :  { %1877 = vrcp.f32 %v647_v47 }
 0xa54   :  { %v1878_v48 = vpop.eup %1877 }
 0xa55   :  { %v654_v52 = vmul.f32 %v1878_v48, %v652_v51 }
 0xab5   :  { %v657_v49 = vpop.permute.xlu0 %656 }
 0xab6   :  { %v659_v50 = vmul.f32 %v1878_v48, %v657_v49 }
 0xab8   :  { %661 = vrot.lane.b32.xlu1 %v659_v50, %s1947_s24 }
 0xb2a   :  { %v662_v53 = vpop.permute.xlu1 %661 }
 0xb2b   :  { %v664_v54 = vadd.f32 %v662_v53, %v654_v52 }
 0xb2d   :  { %1879 = vtanh.f32 %v664_v54  ;;  %v756_v6 = vrot.slane %v664_v54, 6 }
 0xb3a   :  { %v1880_v41 = vpop.eup %1879 }
 0xb3b   :  { %667 = vrot.lane.b32.xlu0 %v1880_v41, %s1946_s0 }
 0xbad   :  { %v668_v56 = vpop.permute.xlu0 %667 }
 0xbae   :  { %v2109_v57 = vmul.f32 %v1878_v48, %v668_v56 }
 0xbb0   :  { %v672_v58 = vrot.slane %v2109_v57, 6 }
 0xbb2   :  { %673 = vrot.lane.b32.xlu1 %v672_v58, %s1947_s24 }
 0xc24   :  { %v2113_v59 = vpop.permute.xlu1 %673 }
 0xc25   :  { %1751 = vmatmul.mubr.msk.f32.vlgmr.msra.gmra.mxu0 %vm167_vm7, %v2113_v59 }
 0xc26   :  { %1765 = vmatpush3.msra.mxu0 %v1996_v22  ;;  %1772 = vmatprep.mubr.msk.f32.mxu0 %vm1945_vm6, %v1944_v21 }
 0xc27   :  { %1766 = vmatprep.subr.mxu0 %v1944_v21 }
 0xc28   :  { %1767 = vmatpush3.msra.mxu0 %v2000_v24 }
 0xc29   :  { %1768 = vmatprep.subr.mxu0 %v1944_v21 }
 0xc2a   :  { %1769 = vmatpush3.msra.mxu0 %v2004_v26 }
 0xc2b   :  { %1770 = vmatprep.subr.mxu0 %v1944_v21 }
 0xc2c   :  { %1771 = vmatpush3.msra.mxu0 %v2008_v27 }
 0xc2d   :  { %1786 = vmatprep.subr.mxu0 %v1944_v21 }
 0xce5   :  { %v743_v60 = vpop.f32.mrf.mxu0 }
 0xce6   :  { %v747_v61 = vadd.f32 %v743_v60, %v2038_v39 }
 0xce7   :  { %v1752_v62 = vpop.f32.mrf.mxu0 }
 0xce8   :  { %1881 = vtanh.f32 %v747_v61  ;;  %v1603_v0 = vmul.f32 -1.442695, %v747_v61 }
 0xcea   :  { %1883 = vpow2.f32 %v1603_v0 }
 0xcf5   :  { %v1882_v63 = vpop.eup %1881 }
 0xcf6   :  { %760 = vrot.lane.b32.xlu0 %v1882_v63, %s1946_s0 }
 0xcf7   :  { %v1884_v1 = vpop.eup %1883 }
 0xcf8   :  { %v751_v2 = vadd.f32 1.0, %v1884_v1 }
 0xcfa   :  { %1885 = vrcp.f32 %v751_v2 }
 0xd07   :  { %v1886_v3 = vpop.eup %1885 }
 0xd08   :  { %v758_v7 = vmul.f32 %v1886_v3, %v756_v6 }
 0xd68   :  { %v761_v4 = vpop.permute.xlu0 %760 }
 0xd69   :  { %v763_v5 = vmul.f32 %v1886_v3, %v761_v4  ;;  %v1610_v4 = vld [vmem:[#allocation2 + $0xa5] ss:$0 sm:$0xff] }
 0xd6b   :  { %765 = vrot.lane.b32.xlu1 %v763_v5, %s1947_s24 }
 0xddd   :  { %v766_v8 = vpop.permute.xlu1 %765 }
 0xdde   :  { %v768_v9 = vadd.f32 %v766_v8, %v758_v7 }
 0xde0   :  { %1887 = vtanh.f32 %v768_v9 }
 0xded   :  { %v1888_v11 = vpop.eup %1887 }
 0xdee   :  { %771 = vrot.lane.b32.xlu0 %v1888_v11, %s1946_s0 }
 0xe60   :  { %v772_v13 = vpop.permute.xlu0 %771 }
 0xe61   :  { %v2131_v14 = vmul.f32 %v1886_v3, %v772_v13 }
 0xe63   :  { %776 = vrot.lane.b32.xlu1 %v2131_v14, %s1947_s24 }
 0xed5   :  { %v777_v15 = vpop.permute.xlu1 %776 }
 0xed6   :  { %1762 = vmatmul.mubr.msk.f32.vlgmr.msra.gmra.mxu1 %vm167_vm7, %v777_v15 }
 0xed7   :  { %1776 = vmatpush3.msra.mxu1 %v1996_v22  ;;  %1783 = vmatprep.mubr.msk.f32.mxu1 %vm1945_vm6, %v1944_v21 }
 0xed8   :  { %1777 = vmatprep.subr.mxu1 %v1944_v21 }
 0xed9   :  { %1778 = vmatpush3.msra.mxu1 %v2000_v24 }
 0xeda   :  { %1779 = vmatprep.subr.mxu1 %v1944_v21 }
 0xedb   :  { %1780 = vmatpush3.msra.mxu1 %v2004_v26 }
 0xedc   :  { %1781 = vmatprep.subr.mxu1 %v1944_v21 }
 0xedd   :  { %1782 = vmatpush3.msra.mxu1 %v2008_v27  ;;  %v862_v27 = vrot.slane %v768_v9, 6 }
 0xede   :  { %1797 = vmatprep.subr.mxu1 %v1944_v21 }
 0xf96   :  { %v846_v16 = vpop.f32.mrf.mxu1 }
 0xf97   :  { %v851_v17 = vrot.slane %v846_v16, 6 }
 0xf98   :  { %v1763_v22 = vpop.f32.mrf.mxu1 }
 0xf99   :  { %v853_v18 = vadd.f32 %v851_v17, %v2038_v39 }
 0xf9b   :  { %1889 = vtanh.f32 %v853_v18  ;;  %v1605_v24 = vmul.f32 -1.442695, %v853_v18 }
 0xf9d   :  { %1891 = vpow2.f32 %v1605_v24 }
 0xfa8   :  { %v1890_v19 = vpop.eup %1889 }
 0xfa9   :  { %866 = vrot.lane.b32.xlu0 %v1890_v19, %s1946_s0 }
 0xfaa   :  { %v1892_v20 = vpop.eup %1891 }
 0xfab   :  { %v857_v23 = vadd.f32 1.0, %v1892_v20 }
 0xfad   :  { %1893 = vrcp.f32 %v857_v23 }
 0xfba   :  { %v1894_v26 = vpop.eup %1893 }
 0xfbb   :  { %v864_v29 = vmul.f32 %v1894_v26, %v862_v27 }
0x101b   :  { %v867_v25 = vpop.permute.xlu0 %866 }
0x101c   :  { %v869_v28 = vmul.f32 %v1894_v26, %v867_v25 }
0x101e   :  { %871 = vrot.lane.b32.xlu1 %v869_v28, %s1947_s24 }
0x1090   :  { %v872_v30 = vpop.permute.xlu1 %871 }
0x1091   :  { %v874_v31 = vadd.f32 %v872_v30, %v864_v29 }
0x1093   :  { %1895 = vtanh.f32 %v874_v31  ;;  %v969_v52 = vrot.slane %v874_v31, 6 }
0x10a0   :  { %v1896_v32 = vpop.eup %1895 }
0x10a1   :  { %877 = vrot.lane.b32.xlu0 %v1896_v32, %s1946_s0 }
0x1113   :  { %v878_v33 = vpop.permute.xlu0 %877 }
0x1114   :  { %v880_v34 = vmul.f32 %v1894_v26, %v878_v33 }
0x1116   :  { %v882_v36 = vrot.slane %v880_v34, 2 }
0x1118   :  { %883 = vrot.lane.b32.xlu1 %v882_v36, %s1947_s24 }
0x118a   :  { %v2151_v38 = vpop.permute.xlu1 %883 }
0x118b   :  { %1773 = vmatmul.mubr.msk.f32.vlgmr.msra.gmra.mxu0 %vm167_vm7, %v2151_v38 }
0x118c   :  { %1794 = vmatprep.mubr.msk.f32.mxu0 %vm1945_vm6, %v1944_v21 }
0x124b   :  { %v953_v40 = vpop.f32.mrf.mxu0 }
0x124c   :  { %v958_v42 = vrot.slane %v953_v40, 4 }
0x124d   :  { %v1774_v43 = vpop.f32.mrf.mxu0 }
0x124e   :  { %v960_v44 = vadd.f32 %v958_v42, %v2038_v39 }
0x1250   :  { %1897 = vtanh.f32 %v960_v44  ;;  %v1607_v46 = vmul.f32 -1.442695, %v960_v44 }
0x1252   :  { %1899 = vpow2.f32 %v1607_v46  ;;  %v2194_v46 = vld [vmem:[#allocation2 + $0xaa] sm:$0x1] }
0x1253   :  { %1819 = vpush %v2194_v46 }
0x125d   :  { %v1898_v45 = vpop.eup %1897 }
0x125e   :  { %973 = vrot.lane.b32.xlu0 %v1898_v45, %s1946_s0 }
0x125f   :  { %v1900_v47 = vpop.eup %1899 }
0x1260   :  { %v964_v48 = vadd.f32 1.0, %v1900_v47 }
0x1262   :  { %1901 = vrcp.f32 %v964_v48 }
0x126f   :  { %v1902_v49 = vpop.eup %1901 }
0x1270   :  { %v971_v53 = vmul.f32 %v1902_v49, %v969_v52  ;;  %v1302_v52 = vld [vmem:[#allocation2 + $0x40] sm:$0xff] }
0x12d0   :  { %v974_v50 = vpop.permute.xlu0 %973 }
0x12d1   :  { %v976_v51 = vmul.f32 %v1902_v49, %v974_v50  ;;  %v1304_v50 = vld [vmem:[#allocation2 + $0x50] sm:$0xff] }
0x12d3   :  { %978 = vrot.lane.b32.xlu1 %v976_v51, %s1947_s24  ;;  %v1303_v51 = vld [vmem:[#allocation2 + $0x48] sm:$0xff] }
0x1345   :  { %v979_v54 = vpop.permute.xlu1 %978 }
0x1346   :  { %v981_v41 = vadd.f32 %v979_v54, %v971_v53  ;;  %v1301_v53 = vld [vmem:[%s2242_s1] sm:$0x3]  ;;  %s1820_s1 = spop %1819 }
0x1348   :  { %1903 = vtanh.f32 %v981_v41  ;;  %v1076_v22 = vrot.slane %v981_v41, 6 }
0x1355   :  { %v1904_v56 = vpop.eup %1903 }
0x1356   :  { %984 = vrot.lane.b32.xlu0 %v1904_v56, %s1946_s0 }
0x13c8   :  { %v985_v58 = vpop.permute.xlu0 %984 }
0x13c9   :  { %v987_v60 = vmul.f32 %v1902_v49, %v985_v58  ;;  %v1305_v49 = vld [vmem:[#allocation2 + $0x58] sm:$0xff] }
0x13ca   :  { %1787 = vmatpush3.msra.mxu0 %v1305_v49 }
0x13cb   :  { %v989_v61 = vrot.slane %v987_v60, 4  ;;  %1788 = vmatprep.subr.mxu0 %v1944_v21 }
0x13cc   :  { %1789 = vmatpush3.msra.mxu0 %v1304_v50 }
0x13cd   :  { %990 = vrot.lane.b32.xlu1 %v989_v61, %s1947_s24  ;;  %1790 = vmatprep.subr.mxu0 %v1944_v21 }
0x13ce   :  { %1791 = vmatpush3.msra.mxu0 %v1303_v51 }
0x13cf   :  { %1792 = vmatprep.subr.mxu0 %v1944_v21 }
0x13d0   :  { %1793 = vmatpush3.msra.mxu0 %v1302_v52 }
0x13d1   :  { %1795 = vmatmul.mubr.msk.f32.vlgmr.msra.gmra.mxu0 %vm167_vm7, %v1301_v53  ;;  %1804 = vmatprep.subr.mxu0 %v1944_v21 }
0x13d2   :  { %1816 = vmatprep.mubr.msk.f32.mxu0 %vm1945_vm6, %v1944_v21 }
0x143f   :  { %v2162_v62 = vpop.permute.xlu1 %990 }
0x1440   :  { %1784 = vmatmul.mubr.msk.f32.vlgmr.msra.gmra.mxu1 %vm167_vm7, %v2162_v62 }
0x1441   :  { %1801 = vmatprep.mubr.msk.f32.mxu1 %vm1945_vm6, %v1944_v21 }
0x1500   :  { %v1060_v63 = vpop.f32.mrf.mxu1 }
0x1501   :  { %v1065_v0 = vrot.slane %v1060_v63, 2 }
0x1502   :  { %v1785_v1 = vpop.f32.mrf.mxu1 }
0x1503   :  { %v1067_v2 = vadd.f32 %v1065_v0, %v2038_v39 }
0x1505   :  { %1905 = vtanh.f32 %v1067_v2  ;;  %v1609_v5 = vmul.f32 -1.442695, %v1067_v2 }
0x1507   :  { %1907 = vpow2.f32 %v1609_v5 }
0x1512   :  { %v1906_v3 = vpop.eup %1905 }
0x1513   :  { %1080 = vrot.lane.b32.xlu0 %v1906_v3, %s1946_s0 }
0x1514   :  { %v1908_v6 = vpop.eup %1907 }
0x1515   :  { %v1071_v7 = vadd.f32 1.0, %v1908_v6 }
0x1517   :  { %1102 = vrot.lane.b32.xlu0 %v1610_v4, %s1948_s25  ;;  %1909 = vrcp.f32 %v1071_v7 }
0x1524   :  { %v1910_v8 = vpop.eup %1909 }
0x1525   :  { %v1078_v18 = vmul.f32 %v1910_v8, %v1076_v22 }
0x1585   :  { %v1081_v9 = vpop.permute.xlu0 %1080 }
0x1586   :  { %v1083_v11 = vmul.f32 %v1910_v8, %v1081_v9 }
0x1588   :  { %1085 = vrot.lane.b32.xlu1 %v1083_v11, %s1947_s24 }
0x1589   :  { %v1103_v13 = vpop.permute.xlu0 %1102 }
0x158a   :  { %v1114_v39 = vmul.f32 %v1103_v13, %v2065_v10  ;;  %v1105_v15 = vmul.f32 %v1103_v13, %v2046_v55  ;;  %v1149_v16 = vmul.f32 %v1103_v13, %v880_v34  ;;  %v1157_v17 = vmul.f32 %v1103_v13, %v987_v60 }
0x158b   :  { %v1123_v28 = vmul.f32 %v1103_v13, %v2087_v35  ;;  %v1132_v27 = vmul.f32 %v1103_v13, %v2109_v57  ;;  %v1141_v29 = vmul.f32 %v1103_v13, %v2131_v14 }
0x158c   :  { %1116 = vrot.lane.b32.xlu0 %v1114_v39, %s1947_s24  ;;  %v1204_v39 = vstv %s1820_s1 }
0x1590   :  { %1107 = vrot.lane.b32.xlu0 %v1105_v15, %s1947_s24 }
0x1594   :  { %1151 = vrot.lane.b32.xlu0 %v1149_v16, %s1947_s24 }
0x1598   :  { %1159 = vrot.lane.b32.xlu0 %v1157_v17, %s1947_s24 }
0x15fa   :  { %v1086_v19 = vpop.permute.xlu1 %1085 }
0x15fb   :  { %v1088_v24 = vadd.f32 %v1086_v19, %v1078_v18  ;;  %v1949_v18 = vmov 2   ;;  %v1950_v19 = vmov 1  }
0x15fc   :  { %1841 = vset.pattern.permute.xlu1 %v1949_v18  ;;  %1840 = vset.pattern.permute.xlu0 %v1950_v19 }
0x15fd   :  { %1911 = vtanh.f32 %v1088_v24  ;;  %v1611_v24 = vld [vmem:[#allocation2 + $0xa6] ss:$0 sm:$0xff] }
0x15fe   :  { %v1117_v20 = vpop.permute.xlu0 %1116 }
0x15ff   :  { %v1120_v10 = vsel %vm1119_vm8, %v1117_v20, 0.0  ;;  %v1380_v20 = vpop.f32.mrf.mxu0 }
0x1600   :  { %1121 = vadd.xlane.f32.xlu0 %v1120_v10  ;;  %v1386_v10 = vld [vmem:[#allocation2 + $0x68] sm:$0xff] }
0x1601   :  { %1798 = vmatpush3.msra.mxu1 %v1386_v10 }
0x1602   :  { %v1108_v23 = vpop.permute.xlu0 %1107  ;;  %1799 = vmatprep.subr.mxu1 %v1944_v21 }
0x1603   :  { %v1111_v26 = vsel %vm1110_vm9, %v1108_v23, 0.0  ;;  %v1385_v23 = vld [vmem:[#allocation2 + $0x60] sm:$0xff] }
0x1604   :  { %1112 = vadd.xlane.f32.xlu0 %v1111_v26  ;;  %v1381_v26 = vadd.f32 %v1611_v24, %v1380_v20  ;;  %1800 = vmatpush3.msra.mxu1 %v1385_v23  ;;  %v1615_v23 = vld [vmem:[#allocation2 + $0xa8] ss:$0 sm:$0xff] }
0x1606   :  { %v1152_v40 = vpop.permute.xlu0 %1151 }
0x1607   :  { %v1154_v43 = vsel %vm1119_vm8, %v1152_v40, 0.0  ;;  %v1956_v40 = vmov 7  }
0x160a   :  { %v1912_v25 = vpop.eup %1911  ;;  %v1160_v44 = vpop.permute.xlu0 %1159 }
0x160b   :  { %1091 = vrot.lane.b32.xlu1 %v1912_v25, %s1946_s0  ;;  %v1162_v45 = vsel %vm1128_vm11, %v1160_v44, 0.0  ;;  %v1796_v25 = vpop.f32.mrf.mxu0 }
0x160f   :  { %1125 = vrot.lane.b32.xlu1 %v1123_v28, %s1947_s24  ;;  %v1384_v28 = vmax.f32 %v1381_v26, 0.0 }
0x1611   :  { %1802 = vmatmul.mubr.msk.f32.vlgmr.msra.gmra.mxu1 %vm1392_vm1, %v1384_v28 }
0x1613   :  { %1134 = vrot.lane.b32.xlu1 %v1132_v27, %s1947_s24 }
0x1617   :  { %1143 = vrot.lane.b32.xlu1 %v1141_v29, %s1947_s24 }
0x167d   :  { %v1092_v30 = vpop.permute.xlu1 %1091 }
0x167e   :  { %v2187_v31 = vmul.f32 %v1910_v8, %v1092_v30 }
0x1680   :  { %v1165_v32 = vmul.f32 %v1103_v13, %v2187_v31 }
0x1681   :  { %v1126_v33 = vpop.permute.xlu1 %1125 }
0x1682   :  { %1167 = vrot.lane.b32.xlu1 %v1165_v32, %s1947_s24  ;;  %v1129_v42 = vsel %vm1128_vm11, %v1126_v33, 0.0  ;;  %v1951_v33 = vmov 3  }
0x1685   :  { %v1135_v35 = vpop.permute.xlu1 %1134 }
0x1686   :  { %v1138_v34 = vsel %vm1137_vm10, %v1135_v35, 0.0  ;;  %v1952_v35 = vmov 0  }
0x1687   :  { %1139 = vadd.xlane.f32.xlu0 %v1138_v34  ;;  %v1953_v34 = vmov 5  }
0x1689   :  { %v1144_v57 = vpop.permute.xlu1 %1143  ;;  %v1122_v54 = vpop.xlane.xlu0 %1121 }
0x168a   :  { %v1146_v36 = vsel %vm1110_vm9, %v1144_v57, 0.0  ;;  %v1174_v60 = vrot.slane %v1122_v54, 2  ;;  %v1954_v57 = vmov 4  }
0x168b   :  { %1147 = vadd.xlane.f32.xlu0 %v1146_v36  ;;  %v1955_v36 = vmov 6  }
0x168d   :  { %v1113_v56 = vpop.xlane.xlu0 %1112 }
0x168e   :  { %v1191_v0 = vsel %vm58_vm3, %v1113_v56, %v1174_v60  ;;  %v1480_v56 = vld [vmem:[#allocation2 + $0x90] sm:$0xff]  ;;  %vm1568_vm3 = vcmask 189440  }
0x16a6   :  { %1130 = vadd.xlane.f32.xlu1 %v1129_v42  ;;  %v1290_v42 = vrot.slane %v2187_v31, 6 }
0x16aa   :  { %1155 = vadd.xlane.f32.xlu1 %v1154_v43 }
0x16ae   :  { %1163 = vadd.xlane.f32.xlu1 %v1162_v45 }
0x16f4   :  { %v1168_v47 = vpop.permute.xlu1 %1167 }
0x16f5   :  { %v1170_v48 = vsel %vm1137_vm10, %v1168_v47, 0.0 }
0x16f6   :  { %1171 = vadd.xlane.f32.xlu0 %v1170_v48 }
0x1710   :  { %v1140_v63 = vpop.xlane.xlu0 %1139 }
0x1711   :  { %v1180_v2 = vrot.slane %v1140_v63, 6 }
0x1714   :  { %v1148_v5 = vpop.xlane.xlu0 %1147 }
0x172f   :  { %v1131_v41 = vpop.xlane.xlu1 %1130 }
0x1730   :  { %v1177_v58 = vrot.slane %v1131_v41, 4  ;;  %v1481_v41 = vld [vmem:[#allocation2 + $0x98] sm:$0xff] }
0x1731   :  { %1805 = vmatpush3.msra.mxu0 %v1481_v41 }
0x1732   :  { %v1192_v1 = vsel %vm61_vm4, %v1191_v0, %v1177_v58  ;;  %1806 = vmatprep.subr.mxu0 %v1944_v21  ;;  %vm1581_vm4 = vcmask 1024  }
0x1733   :  { %v1156_v61 = vpop.xlane.xlu1 %1155  ;;  %v1193_v3 = vsel %vm70_vm5, %v1192_v1, %v1180_v2  ;;  %1807 = vmatpush3.msra.mxu0 %v1480_v56 }
0x1734   :  { %v1183_v6 = vrot.slane %v1156_v61, 2  ;;  %v1195_v7 = vsel %vm1194_vm12, %v1193_v3, %v1148_v5  ;;  %1808 = vmatprep.subr.mxu0 %v1944_v21 }
0x1736   :  { %v1197_v11 = vsel %vm1196_vm13, %v1195_v7, %v1183_v6 }
0x1737   :  { %v1164_v4 = vpop.xlane.xlu1 %1163 }
0x1738   :  { %v1186_v8 = vrot.slane %v1164_v4, 4 }
0x173a   :  { %v1199_v15 = vsel %vm1198_vm14, %v1197_v11, %v1186_v8  ;;  %v1478_v8 = vld [vmem:[#allocation2 + $0x80] sm:$0xff] }
0x177f   :  { %v1172_v9 = vpop.xlane.xlu0 %1171 }
0x1780   :  { %v1189_v13 = vrot.slane %v1172_v9, 6  ;;  %v1477_v9 = vld [vmem:[#allocation2 + $0x78] sm:$0xff] }
0x1782   :  { %v1201_v16 = vsel %vm1200_vm15, %v1199_v15, %v1189_v13  ;;  %v1613_v15 = vld [vmem:[#allocation2 + $0xa7] ss:$0 sm:$0xff] }
0x1783   :  { %v1206_v17 = vadd.f32 %v1204_v39, %v1201_v16  ;;  %v1476_v39 = vld [vmem:[#allocation2 + $0x70] sm:$0xff] }
0x1785   :  { %v1208_v22 = vsel %vm1207_vm0, %v1206_v17, -inf }
0x1786   :  { %1209 = vmax.xlane.f32.xlu1 %v1208_v22 }
0x180f   :  { %v1210_v27 = vpop.xlane.xlu1 %1209 }
0x1810   :  { %v1211_v29 = vsub.f32 %v1206_v17, %v1210_v27  ;;  %v1617_v27 = vld [vmem:[#allocation2 + $0xa9] ss:$0 sm:$0xff] }
0x1812   :  { %v1212_v30 = vmul.f32 1.442695, %v1211_v29 }
0x1814   :  { %1913 = vpow2.f32 %v1212_v30 }
0x1821   :  { %v1914_v32 = vpop.eup %1913 }
0x1822   :  { %1236 = vperm.xlu1 %1841, %v1914_v32   ;;  %1225 = vperm.xlu0 %1840, %v1914_v32   ;;  %v1214_v43 = vsel %vm1207_vm0, %v1914_v32, 0.0 }
0x1826   :  { %1842 = vset.pattern.permute.xlu1 %v1951_v33  ;;  %1846 = vset.pattern.permute.xlu0 %v1952_v35  ;;  %v1572_v33 = vlaneseq }
0x1827   :  { %1247 = vperm.xlu1 %1842, %v1914_v32   ;;  %1220 = vperm.xlu0 %1846, %v1914_v32  }
0x1828   :  { %v1573_v35 = vshrl.u32 %v1572_v33, 7 }
0x182b   :  { %1843 = vset.pattern.permute.xlu1 %v1953_v34  ;;  %1847 = vset.pattern.permute.xlu0 %v1954_v57  ;;  %v1574_v34 = vsub.s32 0, %v1573_v35 }
0x182c   :  { %1264 = vperm.xlu1 %1843, %v1914_v32   ;;  %1258 = vperm.xlu0 %1847, %v1914_v32  }
0x182d   :  { %v1575_v57 = vrot.slane %v2194_v46, %v1574_v34 }
0x1830   :  { %1844 = vset.pattern.permute.xlu1 %v1955_v36  ;;  %1848 = vset.pattern.permute.xlu0 %v1956_v40 }
0x1831   :  { %1275 = vperm.xlu1 %1844, %v1914_v32  }
0x1835   :  { %1845 = vset.pattern.permute.xlu1 %v1956_v40 }
0x1836   :  { %1286 = vperm.xlu1 %1845, %v1914_v32  }
0x183a   :  { %1291 = vrot.lane.b32.xlu1 %v1290_v42, %s1947_s24 }
0x185e   :  { %1215 = vadd.xlane.f32.xlu1 %v1214_v43 }
0x189d   :  { %v1237_v44 = vpop.permute.xlu1 %1236  ;;  %v1226_v45 = vpop.permute.xlu0 %1225 }
0x189e   :  { %v1229_v47 = vmul.f32 %v1226_v45, %v2069_v12  ;;  %v1240_v48 = vmul.f32 %v1237_v44, %v2091_v37  ;;  %v1462_v12 = vpop.f32.mrf.mxu1 }
0x18a0   :  { %1231 = vrot.lane.b32.xlu0 %v1229_v47, %s1948_s25  ;;  %v1803_v54 = vpop.f32.mrf.mxu1 }
0x18a2   :  { %v1248_v49 = vpop.permute.xlu1 %1247 }
0x18a3   :  { %v1251_v50 = vmul.f32 %v1248_v49, %v2113_v59  ;;  %v1479_v59 = vld [vmem:[#allocation2 + $0x88] sm:$0xff] }
0x18a4   :  { %1242 = vrot.lane.b32.xlu0 %v1240_v48, %s1948_s25  ;;  %1809 = vmatpush3.msra.mxu0 %v1479_v59 }
0x18a5   :  { %1810 = vmatprep.subr.mxu0 %v1944_v21 }
0x18a6   :  { %1811 = vmatpush3.msra.mxu0 %v1478_v8 }
0x18a7   :  { %v1265_v51 = vpop.permute.xlu1 %1264  ;;  %1812 = vmatprep.subr.mxu0 %v1944_v21 }
0x18a8   :  { %1253 = vrot.lane.b32.xlu0 %v1251_v50, %s1948_s25  ;;  %v1268_v31 = vmul.f32 %v1265_v51, %v2151_v38  ;;  %v1221_v38 = vpop.permute.xlu0 %1220  ;;  %1813 = vmatpush3.msra.mxu0 %v1477_v9 }
0x18a9   :  { %v1223_v0 = vmul.f32 %v1221_v38, %v2046_v55  ;;  %1814 = vmatprep.subr.mxu0 %v1944_v21 }
0x18aa   :  { %1815 = vmatpush3.msra.mxu0 %v1476_v39 }
0x18ac   :  { %v1276_v52 = vpop.permute.xlu1 %1275  ;;  %1270 = vrot.lane.b32.xlu0 %v1268_v31, %s1948_s25 }
0x18ad   :  { %v1279_v53 = vmul.f32 %v1276_v52, %v2162_v62  ;;  %v1259_v62 = vpop.permute.xlu0 %1258 }
0x18ae   :  { %v1261_v6 = vmul.f32 %v1259_v62, %v2131_v14  ;;  %v1463_v14 = vadd.f32 %v1613_v15, %v1462_v12 }
0x18af   :  { %1281 = vrot.lane.b32.xlu1 %v1279_v53, %s1948_s25 }
0x18b0   :  { %v1466_v24 = vmax.f32 %v1463_v14, 0.0 }
0x18b1   :  { %v1287_v37 = vpop.permute.xlu1 %1286 }
0x18b5   :  { %v1292_v58 = vpop.permute.xlu1 %1291 }
0x18b6   :  { %v1294_v60 = vmul.f32 %v1292_v58, %v1287_v37 }
0x18b8   :  { %1296 = vrot.lane.b32.xlu0 %v1294_v60, %s1948_s25 }
0x18e7   :  { %v1216_v4 = vpop.xlane.xlu1 %1215 }
0x18e8   :  { %1915 = vrcp.f32 %v1216_v4 }
0x18f5   :  { %v1916_v18 = vpop.eup %1915 }
0x1912   :  { %v1232_v61 = vpop.permute.xlu0 %1231 }
0x1913   :  { %v1234_v1 = vadd.f32 %v1232_v61, %v1223_v0 }
0x1916   :  { %v1243_v63 = vpop.permute.xlu0 %1242 }
0x1917   :  { %v1245_v3 = vadd.f32 %v1243_v63, %v1234_v1 }
0x191a   :  { %v1254_v2 = vpop.permute.xlu0 %1253 }
0x191b   :  { %v1256_v5 = vadd.f32 %v1254_v2, %v1245_v3 }
0x191d   :  { %v1262_v7 = vadd.f32 %v1261_v6, %v1256_v5 }
0x191e   :  { %v1271_v11 = vpop.permute.xlu0 %1270 }
0x191f   :  { %v1273_v13 = vadd.f32 %v1271_v11, %v1262_v7 }
0x1921   :  { %v1282_v55 = vpop.permute.xlu1 %1281 }
0x1922   :  { %v1284_v16 = vadd.f32 %v1282_v55, %v1273_v13 }
0x192a   :  { %v1297_v17 = vpop.permute.xlu0 %1296 }
0x192b   :  { %v1299_v22 = vadd.f32 %v1297_v17, %v1284_v16 }
0x192d   :  { %v1300_v19 = vmul.f32 %v1916_v18, %v1299_v22 }
0x192f   :  { %1468 = vrot.lane.b32.xlu0 %v1300_v19, %s1947_s24 }
0x1933   :  { %1472 = vrot.lane.b32.xlu0 %v1466_v24, %s1947_s24 }
0x19a1   :  { %v1469_v20 = vpop.permute.xlu0 %1468 }
0x19a5   :  { %v1473_v10 = vpop.permute.xlu0 %1472 }
0x19a6   :  { %v1475_v21 = vsel %vm167_vm7, %v1469_v20, %v1473_v10 }
0x19a7   :  { %1817 = vmatmul.mubr.msk.f32.vlgmr.msra.gmra.mxu0 %vm1487_vm2, %v1475_v21 }
0x1a67   :  { %v1557_v26 = vpop.f32.mrf.mxu0 }
0x1a68   :  { %v1558_v25 = vadd.f32 %v1615_v23, %v1557_v26 }
0x1a69   :  { %v1818_v28 = vpop.f32.mrf.mxu0 }
0x1a6a   :  { %v1561_v29 = vmax.f32 %v1558_v25, 0.0 }
0x1a6c   :  { %v1567_v30 = vmul.f32 %v1617_v27, %v1561_v29 }
0x1a6e   :  { %v1569_v32 = vsel %vm1568_vm3, %v1567_v30, 0.0 }
0x1a6f   :  { %1570 = vadd.xlane.f32.xlu0 %v1569_v32 }
0x1af8   :  { %v1571_v36 = vpop.xlane.xlu0 %1570 }
0x1af9   :  { %v1576_v40 = vadd.f32 %v1575_v57, %v1571_v36 }
0x1afb   :  { %1578 = vrot.lane.b32.xlu1 %v1576_v40, %s1957_s28 }
0x1b6d   :  { %v1579_v42 = vpop.permute.xlu1 %1578 }
0x1b6e   :  { %1582 = vst.msk [vmem:[%s2244_s3] sm:$0x3] %vm1581_vm4, %v1579_v42 }
0x1b6f   :  { %1587 = vsyncpa [#allocation3], 1 }

</bundles_post_ra>
